<compile_context>
chip_gen: v5e
topology: v5e:2x2
jax: 0.10.0
libtpu: 0.0.40
codegen_flags: <defaults>
</compile_context>

<pallas_src>
import functools

import jax
import jax.numpy as jnp
from jax.experimental import pallas as pl
from jax.experimental.pallas import tpu as pltpu

K = 3            # conv kernel size
C1 = 16          # conv1 out channels
C2 = 8           # conv2 out channels
NEG_SLOPE = 0.1  # LeakyReLU slope used by the module


def _leaky_relu(x):
    return jnp.where(x > 0, x, NEG_SLOPE * x)


def mixup_disc_kernel(x_ref, w1_ref, w2_ref, b2_ref, fcw_ref, fcb_ref,
                      out_ref, *, H, Bt):
    """One batch tile.  All activations are (C, L*Bt) with batch on lanes."""
    L1 = H - (K - 1)
    L2 = H - 2 * (K - 1)

    x = x_ref[0]            # (1, H*Bt)   merged (h, b), b fastest
    w1 = w1_ref[...]        # (C1, K+1)   conv1 weight with bias column folded
    w2 = w2_ref[...]        # (K, C2, C1)
    b2 = b2_ref[...]        # (C2, 1)
    fcw = fcw_ref[...]      # (C2, L2*Bt) fc weight pre-broadcast along lanes
    fcb = fcb_ref[0, 0]     # scalar (SMEM)

    # ---- conv1: im2col of K shifted views + ones row (folded bias), one MXU
    # matmul.  Every slice start is a multiple of Bt (>=128) -> aligned. ------
    ones_row = jnp.ones((1, L1 * Bt), jnp.float32)
    p1 = jnp.concatenate(
        [x[:, k * Bt:(k + L1) * Bt] for k in range(K)] + [ones_row],
        axis=0)                                                   # (K+1, L1*Bt)
    h1 = _leaky_relu(jnp.dot(w1, p1, preferred_element_type=jnp.float32))
    #                                                               (C1, L1*Bt)

    # ---- conv2: K taps contracting over C1, chained f32 accumulate ---------
    # (keeps accumulation on the MXU result path on v7x; no 48-row RHS
    #  materialization -> no extra vst traffic on v5e)
    h2 = jnp.dot(w2[0], h1[:, :L2 * Bt], preferred_element_type=jnp.float32)
    for k in range(1, K):
        h2 = h2 + jnp.dot(w2[k], h1[:, k * Bt:(k + L2) * Bt],
                          preferred_element_type=jnp.float32)     # (C2, L2*Bt)
    h2 = _leaky_relu(h2 + b2)

    # ---- fc: full-slab VPU multiply-accumulate into (C2, Bt), then a single
    # cross-sublane reduce (replaces L2 XLU reduces + L2 lane broadcasts) ----
    acc8 = fcw[:, :Bt] * h2[:, :Bt]
    for l in range(1, L2):
        acc8 = acc8 + fcw[:, l * Bt:(l + 1) * Bt] * h2[:, l * Bt:(l + 1) * Bt]
    out_ref[0] = jnp.sum(acc8, axis=0, keepdims=True) + fcb       # (1, Bt)


def _ceil_to(n, m):
    return ((n + m - 1) // m) * m


def _select_tile(B, H, b_tile):
    """Pick (nT, Bt, per_elem_bytes).

    Bt is a 128-multiple chosen to minimize zero-padding; at least 2 grid
    steps whenever B > 128 (so v7x's two TensorCores both get work); the tile
    cap is derived from a VMEM budget that is safe on v7x (64 MiB per TC).
    """
    L1 = H - (K - 1)
    L2 = H - 2 * (K - 1)
    # Generous per-batch-element f32 VMEM estimate: double-buffered input,
    # p1 / h1 (+ elementwise temps) / h2 slabs, resident fc weight slab, acc8.
    per_elem = 4 * (2 * H + (K + 1) * L1 + 2 * C1 * L1 + 5 * C2 * L2 + 16)
    budget = 36 * 1024 * 1024                    # safe within v7x's 64 MiB
    cap = max(128, (budget // per_elem) // 128 * 128)
    cap = min(cap, _ceil_to(max(b_tile, 128), 128))

    B128 = _ceil_to(B, 128)
    if B128 <= 128:
        return 1, 128, per_elem
    nT = max(2, pl.cdiv(B128, cap))              # >=2 tiles -> megacore shards
    Bt = _ceil_to(pl.cdiv(B, nT), 128)           # minimize padding
    nT = pl.cdiv(B, Bt)
    return nT, Bt, per_elem


def mixup_discriminator(x, params, *, b_tile=2048):
    """x: (B, H) float32.  params: dict of torch-shaped weights."""
    B, H = x.shape
    L2 = H - 2 * (K - 1)

    nT, Bt, per_elem = _select_tile(B, H, b_tile)
    Bp = nT * Bt
    vmem_limit = int(min(48 * 1024 * 1024,
                         max(32 * 1024 * 1024, per_elem * Bt + (2 << 20))))

    # Host-side weight permutation / reshaping (pure glue, no compute).
    w1 = jnp.concatenate([params["conv1_w"][:, 0, :],
                          params["conv1_b"][:, None]], axis=1)    # (C1, K+1)
    w2 = jnp.transpose(params["conv2_w"], (2, 0, 1))              # (K, C2, C1)
    b2 = params["conv2_b"][:, None]                               # (C2, 1)
    fcw = params["fc_w"][0].reshape(C2, L2)                       # (C2, L2)
    fcw_rep = jnp.repeat(fcw, Bt, axis=1)                         # (C2, L2*Bt)
    fcb = params["fc_b"].reshape(1, 1)                            # (1, 1)

    # Layout plumbing: pad batch, put batch on lanes, merge (H, B_tile).
    # TODO(synk): accept batch-minor input from the producer to drop this.
    xp = jnp.pad(x.astype(jnp.float32), ((0, Bp - B), (0, 0)))    # (Bp, H)
    xm = xp.reshape(nT, Bt, H).transpose(0, 2, 1).reshape(nT, 1, H * Bt)

    kernel = functools.partial(mixup_disc_kernel, H=H, Bt=Bt)
    out = pl.pallas_call(
        kernel,
        out_shape=jax.ShapeDtypeStruct((nT, 1, Bt), jnp.float32),
        grid=(nT,),
        in_specs=[
            pl.BlockSpec((1, 1, H * Bt), lambda i: (i, 0, 0)),    # x tile
            pl.BlockSpec((C1, K + 1), lambda i: (0, 0)),          # w1+bias (resident)
            pl.BlockSpec((K, C2, C1), lambda i: (0, 0, 0)),       # w2
            pl.BlockSpec((C2, 1), lambda i: (0, 0)),              # b2
            pl.BlockSpec((C2, L2 * Bt), lambda i: (0, 0)),        # fc weight (lane-broadcast)
            pl.BlockSpec((1, 1), lambda i: (0, 0),
                         memory_space=pltpu.MemorySpace.SMEM),    # fc bias
        ],
        out_specs=pl.BlockSpec((1, 1, Bt), lambda i: (i, 0, 0)),
        compiler_params=pltpu.CompilerParams(
            dimension_semantics=("parallel",),
            vmem_limit_bytes=vmem_limit,
        ),
    )(xm, w1, w2, b2, fcw_rep, fcb)

    return out.reshape(Bp, 1)[:B]


def reference(x, params):
    """Pure-JAX reference mirroring the PyTorch forward exactly."""
    B, H = x.shape
    L1 = H - (K - 1)
    L2 = H - 2 * (K - 1)
    w1, b1 = params["conv1_w"], params["conv1_b"]   # (16,1,3), (16,)
    w2, b2 = params["conv2_w"], params["conv2_b"]   # (8,16,3), (8,)
    fcw, fcb = params["fc_w"], params["fc_b"]       # (1, 8*L2), (1,)

    xin = x[:, None, :]                                                # (B,1,H)
    patches1 = jnp.stack([xin[:, :, k:k + L1] for k in range(K)], -1)  # (B,1,L1,K)
    h1 = (jnp.einsum("bclk,ock->bol", patches1, w1, precision="highest")
          + b1[None, :, None])
    h1 = jnp.where(h1 > 0, h1, NEG_SLOPE * h1)                         # (B,16,L1)

    patches2 = jnp.stack([h1[:, :, k:k + L2] for k in range(K)], -1)   # (B,16,L2,K)
    h2 = (jnp.einsum("bclk,ock->bol", patches2, w2, precision="highest")
          + b2[None, :, None])
    h2 = jnp.where(h2 > 0, h2, NEG_SLOPE * h2)                         # (B,8,L2)

    flat = h2.reshape(B, -1)                                           # (B, 8*L2)
    return jnp.dot(flat, fcw.T, precision="highest") + fcb[None, :]    # (B,1)


if __name__ == "__main__":
    hidden_dim = 32
    L2 = hidden_dim - 2 * (K - 1)
    fc_in = C2 * L2  # 8 * (hidden_dim - 4)

    key = jax.random.PRNGKey(0)
    ks = jax.random.split(key, 8)
    params = {
        "conv1_w": 0.2 * jax.random.normal(ks[0], (C1, 1, K), jnp.float32),
        "conv1_b": 0.1 * jax.random.normal(ks[1], (C1,), jnp.float32),
        "conv2_w": 0.2 * jax.random.normal(ks[2], (C2, C1, K), jnp.float32),
        "conv2_b": 0.1 * jax.random.normal(ks[3], (C2,), jnp.float32),
        "fc_w": 0.1 * jax.random.normal(ks[4], (1, fc_in), jnp.float32),
        "fc_b": 0.1 * jax.random.normal(ks[5], (1,), jnp.float32),
    }

    # Case 1: module-scale shapes (batch_size=2, hidden_dim=32) -> single tile.
    x_small = jax.random.normal(ks[6], (2, hidden_dim), jnp.float32)
    out = jax.block_until_ready(mixup_discriminator(x_small, params))
    ref = jax.block_until_ready(reference(x_small, params))
    assert out.shape == (2, 1), out.shape
    assert jnp.allclose(out, ref, atol=1e-3, rtol=1e-3), (out, ref)

    # Case 2: B=300 with the default tile policy -> 2 grid steps (Bt=256),
    # exercises >=2-tile megacore sharding + batch padding.
    x_big = jax.random.normal(ks[7], (300, hidden_dim), jnp.float32)
    out2 = jax.block_until_ready(mixup_discriminator(x_big, params))
    ref2 = jax.block_until_ready(reference(x_big, params))
    assert out2.shape == (300, 1), out2.shape
    assert jnp.allclose(out2, ref2, atol=1e-3, rtol=1e-3), (
        float(jnp.max(jnp.abs(out2 - ref2))))

    # Case 3: forced small tile -> 3 grid steps (Bt=128), multi-tile padding.
    out3 = jax.block_until_ready(mixup_discriminator(x_big, params, b_tile=128))
    assert out3.shape == (300, 1), out3.shape
    assert jnp.allclose(out3, ref2, atol=1e-3, rtol=1e-3), (
        float(jnp.max(jnp.abs(out3 - ref2))))

    print("KERNEL_OK")
</pallas_src>

<mosaic_0001>
module attributes {stable_mosaic.version = 11 : i64} {
  func.func @mixup_disc_kernel(%arg0: i32, %arg1: memref<1x1x4096xf32, #tpu.memory_space<vmem>>, %arg2: memref<16x4xf32, #tpu.memory_space<vmem>>, %arg3: memref<3x8x16xf32, #tpu.memory_space<vmem>>, %arg4: memref<8x1xf32, #tpu.memory_space<vmem>>, %arg5: memref<8x3584xf32, #tpu.memory_space<vmem>>, %arg6: memref<1x1xf32, #tpu.memory_space<smem>>, %arg7: memref<1x1x128xf32, #tpu.memory_space<vmem>>) attributes {dimension_semantics = [#tpu.dimension_semantics<parallel>], iteration_bounds = array<i64: 1>, scalar_prefetch = 0 : i64, scratch_operands = 0 : i64, tpu.core_type = #tpu.core_type<tc>, window_params = [{transform_indices = @transform_0, window_bounds = array<i64: 1, 1, 4096>}, {pipeline_mode = #tpu.pipeline_mode<synchronous>, transform_indices = @transform_1, window_bounds = array<i64: 16, 4>}, {pipeline_mode = #tpu.pipeline_mode<synchronous>, transform_indices = @transform_2, window_bounds = array<i64: 3, 8, 16>}, {pipeline_mode = #tpu.pipeline_mode<synchronous>, transform_indices = @transform_3, window_bounds = array<i64: 8, 1>}, {pipeline_mode = #tpu.pipeline_mode<synchronous>, transform_indices = @transform_4, window_bounds = array<i64: 8, 3584>}, {transform_indices = @transform_5, window_bounds = array<i64: 1, 1>}, {transform_indices = @transform_6, window_bounds = array<i64: 1, 1, 128>}]} {
    %c0 = arith.constant 0 : index
    %c0_0 = arith.constant 0 : index
    %c0_1 = arith.constant 0 : index
    %0 = vector.load %arg1[%c0, %c0_0, %c0_1] : memref<1x1x4096xf32, #tpu.memory_space<vmem>>, vector<1x1x4096xf32>
    %1 = vector.shape_cast %0 : vector<1x1x4096xf32> to vector<1x4096xf32>
    %c0_2 = arith.constant 0 : index
    %c0_3 = arith.constant 0 : index
    %2 = vector.load %arg2[%c0_2, %c0_3] : memref<16x4xf32, #tpu.memory_space<vmem>>, vector<16x4xf32>
    %c0_4 = arith.constant 0 : index
    %c0_5 = arith.constant 0 : index
    %c0_6 = arith.constant 0 : index
    %3 = vector.load %arg3[%c0_4, %c0_5, %c0_6] : memref<3x8x16xf32, #tpu.memory_space<vmem>>, vector<3x8x16xf32>
    %c0_7 = arith.constant 0 : index
    %c0_8 = arith.constant 0 : index
    %4 = vector.load %arg4[%c0_7, %c0_8] : memref<8x1xf32, #tpu.memory_space<vmem>>, vector<8x1xf32>
    %c0_9 = arith.constant 0 : index
    %c0_10 = arith.constant 0 : index
    %5 = vector.load %arg5[%c0_9, %c0_10] : memref<8x3584xf32, #tpu.memory_space<vmem>>, vector<8x3584xf32>
    %c0_11 = arith.constant 0 : index
    %c0_12 = arith.constant 0 : index
    %6 = memref.load %arg6[%c0_11, %c0_12] : memref<1x1xf32, #tpu.memory_space<smem>>
    %cst = arith.constant 1.000000e+00 : f32
    %7 = vector.broadcast %cst : f32 to vector<1x3840xf32>
    %8 = vector.extract_strided_slice %1 {offsets = [0, 0], sizes = [1, 3840], strides = [1, 1]} : vector<1x4096xf32> to vector<1x3840xf32>
    %9 = vector.extract_strided_slice %1 {offsets = [0, 128], sizes = [1, 3840], strides = [1, 1]} : vector<1x4096xf32> to vector<1x3840xf32>
    %10 = vector.extract_strided_slice %1 {offsets = [0, 256], sizes = [1, 3840], strides = [1, 1]} : vector<1x4096xf32> to vector<1x3840xf32>
    %11 = tpu.concatenate %8, %9, %10, %7 in 0 : vector<1x3840xf32>, vector<1x3840xf32>, vector<1x3840xf32>, vector<1x3840xf32> -> vector<4x3840xf32>
    %cst_13 = arith.constant dense<0.000000e+00> : vector<16x3840xf32>
    %12 = tpu.matmul %2, %11, %cst_13 {dimension_numbers = #tpu.dot_dimension_numbers<[1], [0], [0], [1], [0, 0, 1, 1], [], []>} : vector<16x4xf32>, vector<4x3840xf32>, vector<16x3840xf32> -> vector<16x3840xf32>
    %cst_14 = arith.constant 0.000000e+00 : f32
    %13 = vector.broadcast %cst_14 : f32 to vector<16x3840xf32>
    %14 = arith.cmpf ogt, %12, %13 : vector<16x3840xf32>
    %cst_15 = arith.constant 1.000000e-01 : f32
    %15 = vector.broadcast %cst_15 : f32 to vector<16x3840xf32>
    %16 = arith.mulf %15, %12 : vector<16x3840xf32>
    %17 = arith.select %14, %12, %16 : vector<16x3840xi1>, vector<16x3840xf32>
    %18 = vector.extract_strided_slice %3 {offsets = [0, 0, 0], sizes = [1, 8, 16], strides = [1, 1, 1]} : vector<3x8x16xf32> to vector<1x8x16xf32>
    %19 = vector.shape_cast %18 : vector<1x8x16xf32> to vector<8x16xf32>
    %20 = vector.extract_strided_slice %17 {offsets = [0, 0], sizes = [16, 3584], strides = [1, 1]} : vector<16x3840xf32> to vector<16x3584xf32>
    %cst_16 = arith.constant dense<0.000000e+00> : vector<8x3584xf32>
    %21 = tpu.matmul %19, %20, %cst_16 {dimension_numbers = #tpu.dot_dimension_numbers<[1], [0], [0], [1], [0, 0, 1, 1], [], []>} : vector<8x16xf32>, vector<16x3584xf32>, vector<8x3584xf32> -> vector<8x3584xf32>
    %22 = vector.extract_strided_slice %3 {offsets = [1, 0, 0], sizes = [1, 8, 16], strides = [1, 1, 1]} : vector<3x8x16xf32> to vector<1x8x16xf32>
    %23 = vector.shape_cast %22 : vector<1x8x16xf32> to vector<8x16xf32>
    %24 = vector.extract_strided_slice %17 {offsets = [0, 128], sizes = [16, 3584], strides = [1, 1]} : vector<16x3840xf32> to vector<16x3584xf32>
    %cst_17 = arith.constant dense<0.000000e+00> : vector<8x3584xf32>
    %25 = tpu.matmul %23, %24, %cst_17 {dimension_numbers = #tpu.dot_dimension_numbers<[1], [0], [0], [1], [0, 0, 1, 1], [], []>} : vector<8x16xf32>, vector<16x3584xf32>, vector<8x3584xf32> -> vector<8x3584xf32>
    %26 = arith.addf %21, %25 : vector<8x3584xf32>
    %27 = vector.extract_strided_slice %3 {offsets = [2, 0, 0], sizes = [1, 8, 16], strides = [1, 1, 1]} : vector<3x8x16xf32> to vector<1x8x16xf32>
    %28 = vector.shape_cast %27 : vector<1x8x16xf32> to vector<8x16xf32>
    %29 = vector.extract_strided_slice %17 {offsets = [0, 256], sizes = [16, 3584], strides = [1, 1]} : vector<16x3840xf32> to vector<16x3584xf32>
    %cst_18 = arith.constant dense<0.000000e+00> : vector<8x3584xf32>
    %30 = tpu.matmul %28, %29, %cst_18 {dimension_numbers = #tpu.dot_dimension_numbers<[1], [0], [0], [1], [0, 0, 1, 1], [], []>} : vector<8x16xf32>, vector<16x3584xf32>, vector<8x3584xf32> -> vector<8x3584xf32>
    %31 = arith.addf %26, %30 : vector<8x3584xf32>
    %32 = vector.broadcast %4 : vector<8x1xf32> to vector<8x3584xf32>
    %33 = arith.addf %31, %32 : vector<8x3584xf32>
    %cst_19 = arith.constant 0.000000e+00 : f32
    %34 = vector.broadcast %cst_19 : f32 to vector<8x3584xf32>
    %35 = arith.cmpf ogt, %33, %34 : vector<8x3584xf32>
    %cst_20 = arith.constant 1.000000e-01 : f32
    %36 = vector.broadcast %cst_20 : f32 to vector<8x3584xf32>
    %37 = arith.mulf %36, %33 : vector<8x3584xf32>
    %38 = arith.select %35, %33, %37 : vector<8x3584xi1>, vector<8x3584xf32>
    %39 = vector.extract_strided_slice %5 {offsets = [0, 0], sizes = [8, 128], strides = [1, 1]} : vector<8x3584xf32> to vector<8x128xf32>
    %40 = vector.extract_strided_slice %38 {offsets = [0, 0], sizes = [8, 128], strides = [1, 1]} : vector<8x3584xf32> to vector<8x128xf32>
    %41 = arith.mulf %39, %40 : vector<8x128xf32>
    %42 = vector.extract_strided_slice %5 {offsets = [0, 128], sizes = [8, 128], strides = [1, 1]} : vector<8x3584xf32> to vector<8x128xf32>
    %43 = vector.extract_strided_slice %38 {offsets = [0, 128], sizes = [8, 128], strides = [1, 1]} : vector<8x3584xf32> to vector<8x128xf32>
    %44 = arith.mulf %42, %43 : vector<8x128xf32>
    %45 = arith.addf %41, %44 : vector<8x128xf32>
    %46 = vector.extract_strided_slice %5 {offsets = [0, 256], sizes = [8, 128], strides = [1, 1]} : vector<8x3584xf32> to vector<8x128xf32>
    %47 = vector.extract_strided_slice %38 {offsets = [0, 256], sizes = [8, 128], strides = [1, 1]} : vector<8x3584xf32> to vector<8x128xf32>
    %48 = arith.mulf %46, %47 : vector<8x128xf32>
    %49 = arith.addf %45, %48 : vector<8x128xf32>
    %50 = vector.extract_strided_slice %5 {offsets = [0, 384], sizes = [8, 128], strides = [1, 1]} : vector<8x3584xf32> to vector<8x128xf32>
    %51 = vector.extract_strided_slice %38 {offsets = [0, 384], sizes = [8, 128], strides = [1, 1]} : vector<8x3584xf32> to vector<8x128xf32>
    %52 = arith.mulf %50, %51 : vector<8x128xf32>
    %53 = arith.addf %49, %52 : vector<8x128xf32>
    %54 = vector.extract_strided_slice %5 {offsets = [0, 512], sizes = [8, 128], strides = [1, 1]} : vector<8x3584xf32> to vector<8x128xf32>
    %55 = vector.extract_strided_slice %38 {offsets = [0, 512], sizes = [8, 128], strides = [1, 1]} : vector<8x3584xf32> to vector<8x128xf32>
    %56 = arith.mulf %54, %55 : vector<8x128xf32>
    %57 = arith.addf %53, %56 : vector<8x128xf32>
    %58 = vector.extract_strided_slice %5 {offsets = [0, 640], sizes = [8, 128], strides = [1, 1]} : vector<8x3584xf32> to vector<8x128xf32>
    %59 = vector.extract_strided_slice %38 {offsets = [0, 640], sizes = [8, 128], strides = [1, 1]} : vector<8x3584xf32> to vector<8x128xf32>
    %60 = arith.mulf %58, %59 : vector<8x128xf32>
    %61 = arith.addf %57, %60 : vector<8x128xf32>
    %62 = vector.extract_strided_slice %5 {offsets = [0, 768], sizes = [8, 128], strides = [1, 1]} : vector<8x3584xf32> to vector<8x128xf32>
    %63 = vector.extract_strided_slice %38 {offsets = [0, 768], sizes = [8, 128], strides = [1, 1]} : vector<8x3584xf32> to vector<8x128xf32>
    %64 = arith.mulf %62, %63 : vector<8x128xf32>
    %65 = arith.addf %61, %64 : vector<8x128xf32>
    %66 = vector.extract_strided_slice %5 {offsets = [0, 896], sizes = [8, 128], strides = [1, 1]} : vector<8x3584xf32> to vector<8x128xf32>
    %67 = vector.extract_strided_slice %38 {offsets = [0, 896], sizes = [8, 128], strides = [1, 1]} : vector<8x3584xf32> to vector<8x128xf32>
    %68 = arith.mulf %66, %67 : vector<8x128xf32>
    %69 = arith.addf %65, %68 : vector<8x128xf32>
    %70 = vector.extract_strided_slice %5 {offsets = [0, 1024], sizes = [8, 128], strides = [1, 1]} : vector<8x3584xf32> to vector<8x128xf32>
    %71 = vector.extract_strided_slice %38 {offsets = [0, 1024], sizes = [8, 128], strides = [1, 1]} : vector<8x3584xf32> to vector<8x128xf32>
    %72 = arith.mulf %70, %71 : vector<8x128xf32>
    %73 = arith.addf %69, %72 : vector<8x128xf32>
    %74 = vector.extract_strided_slice %5 {offsets = [0, 1152], sizes = [8, 128], strides = [1, 1]} : vector<8x3584xf32> to vector<8x128xf32>
    %75 = vector.extract_strided_slice %38 {offsets = [0, 1152], sizes = [8, 128], strides = [1, 1]} : vector<8x3584xf32> to vector<8x128xf32>
    %76 = arith.mulf %74, %75 : vector<8x128xf32>
    %77 = arith.addf %73, %76 : vector<8x128xf32>
    %78 = vector.extract_strided_slice %5 {offsets = [0, 1280], sizes = [8, 128], strides = [1, 1]} : vector<8x3584xf32> to vector<8x128xf32>
    %79 = vector.extract_strided_slice %38 {offsets = [0, 1280], sizes = [8, 128], strides = [1, 1]} : vector<8x3584xf32> to vector<8x128xf32>
    %80 = arith.mulf %78, %79 : vector<8x128xf32>
    %81 = arith.addf %77, %80 : vector<8x128xf32>
    %82 = vector.extract_strided_slice %5 {offsets = [0, 1408], sizes = [8, 128], strides = [1, 1]} : vector<8x3584xf32> to vector<8x128xf32>
    %83 = vector.extract_strided_slice %38 {offsets = [0, 1408], sizes = [8, 128], strides = [1, 1]} : vector<8x3584xf32> to vector<8x128xf32>
    %84 = arith.mulf %82, %83 : vector<8x128xf32>
    %85 = arith.addf %81, %84 : vector<8x128xf32>
    %86 = vector.extract_strided_slice %5 {offsets = [0, 1536], sizes = [8, 128], strides = [1, 1]} : vector<8x3584xf32> to vector<8x128xf32>
    %87 = vector.extract_strided_slice %38 {offsets = [0, 1536], sizes = [8, 128], strides = [1, 1]} : vector<8x3584xf32> to vector<8x128xf32>
    %88 = arith.mulf %86, %87 : vector<8x128xf32>
    %89 = arith.addf %85, %88 : vector<8x128xf32>
    %90 = vector.extract_strided_slice %5 {offsets = [0, 1664], sizes = [8, 128], strides = [1, 1]} : vector<8x3584xf32> to vector<8x128xf32>
    %91 = vector.extract_strided_slice %38 {offsets = [0, 1664], sizes = [8, 128], strides = [1, 1]} : vector<8x3584xf32> to vector<8x128xf32>
    %92 = arith.mulf %90, %91 : vector<8x128xf32>
    %93 = arith.addf %89, %92 : vector<8x128xf32>
    %94 = vector.extract_strided_slice %5 {offsets = [0, 1792], sizes = [8, 128], strides = [1, 1]} : vector<8x3584xf32> to vector<8x128xf32>
    %95 = vector.extract_strided_slice %38 {offsets = [0, 1792], sizes = [8, 128], strides = [1, 1]} : vector<8x3584xf32> to vector<8x128xf32>
    %96 = arith.mulf %94, %95 : vector<8x128xf32>
    %97 = arith.addf %93, %96 : vector<8x128xf32>
    %98 = vector.extract_strided_slice %5 {offsets = [0, 1920], sizes = [8, 128], strides = [1, 1]} : vector<8x3584xf32> to vector<8x128xf32>
    %99 = vector.extract_strided_slice %38 {offsets = [0, 1920], sizes = [8, 128], strides = [1, 1]} : vector<8x3584xf32> to vector<8x128xf32>
    %100 = arith.mulf %98, %99 : vector<8x128xf32>
    %101 = arith.addf %97, %100 : vector<8x128xf32>
    %102 = vector.extract_strided_slice %5 {offsets = [0, 2048], sizes = [8, 128], strides = [1, 1]} : vector<8x3584xf32> to vector<8x128xf32>
    %103 = vector.extract_strided_slice %38 {offsets = [0, 2048], sizes = [8, 128], strides = [1, 1]} : vector<8x3584xf32> to vector<8x128xf32>
    %104 = arith.mulf %102, %103 : vector<8x128xf32>
    %105 = arith.addf %101, %104 : vector<8x128xf32>
    %106 = vector.extract_strided_slice %5 {offsets = [0, 2176], sizes = [8, 128], strides = [1, 1]} : vector<8x3584xf32> to vector<8x128xf32>
    %107 = vector.extract_strided_slice %38 {offsets = [0, 2176], sizes = [8, 128], strides = [1, 1]} : vector<8x3584xf32> to vector<8x128xf32>
    %108 = arith.mulf %106, %107 : vector<8x128xf32>
    %109 = arith.addf %105, %108 : vector<8x128xf32>
    %110 = vector.extract_strided_slice %5 {offsets = [0, 2304], sizes = [8, 128], strides = [1, 1]} : vector<8x3584xf32> to vector<8x128xf32>
    %111 = vector.extract_strided_slice %38 {offsets = [0, 2304], sizes = [8, 128], strides = [1, 1]} : vector<8x3584xf32> to vector<8x128xf32>
    %112 = arith.mulf %110, %111 : vector<8x128xf32>
    %113 = arith.addf %109, %112 : vector<8x128xf32>
    %114 = vector.extract_strided_slice %5 {offsets = [0, 2432], sizes = [8, 128], strides = [1, 1]} : vector<8x3584xf32> to vector<8x128xf32>
    %115 = vector.extract_strided_slice %38 {offsets = [0, 2432], sizes = [8, 128], strides = [1, 1]} : vector<8x3584xf32> to vector<8x128xf32>
    %116 = arith.mulf %114, %115 : vector<8x128xf32>
    %117 = arith.addf %113, %116 : vector<8x128xf32>
    %118 = vector.extract_strided_slice %5 {offsets = [0, 2560], sizes = [8, 128], strides = [1, 1]} : vector<8x3584xf32> to vector<8x128xf32>
    %119 = vector.extract_strided_slice %38 {offsets = [0, 2560], sizes = [8, 128], strides = [1, 1]} : vector<8x3584xf32> to vector<8x128xf32>
    %120 = arith.mulf %118, %119 : vector<8x128xf32>
    %121 = arith.addf %117, %120 : vector<8x128xf32>
    %122 = vector.extract_strided_slice %5 {offsets = [0, 2688], sizes = [8, 128], strides = [1, 1]} : vector<8x3584xf32> to vector<8x128xf32>
    %123 = vector.extract_strided_slice %38 {offsets = [0, 2688], sizes = [8, 128], strides = [1, 1]} : vector<8x3584xf32> to vector<8x128xf32>
    %124 = arith.mulf %122, %123 : vector<8x128xf32>
    %125 = arith.addf %121, %124 : vector<8x128xf32>
    %126 = vector.extract_strided_slice %5 {offsets = [0, 2816], sizes = [8, 128], strides = [1, 1]} : vector<8x3584xf32> to vector<8x128xf32>
    %127 = vector.extract_strided_slice %38 {offsets = [0, 2816], sizes = [8, 128], strides = [1, 1]} : vector<8x3584xf32> to vector<8x128xf32>
    %128 = arith.mulf %126, %127 : vector<8x128xf32>
    %129 = arith.addf %125, %128 : vector<8x128xf32>
    %130 = vector.extract_strided_slice %5 {offsets = [0, 2944], sizes = [8, 128], strides = [1, 1]} : vector<8x3584xf32> to vector<8x128xf32>
    %131 = vector.extract_strided_slice %38 {offsets = [0, 2944], sizes = [8, 128], strides = [1, 1]} : vector<8x3584xf32> to vector<8x128xf32>
    %132 = arith.mulf %130, %131 : vector<8x128xf32>
    %133 = arith.addf %129, %132 : vector<8x128xf32>
    %134 = vector.extract_strided_slice %5 {offsets = [0, 3072], sizes = [8, 128], strides = [1, 1]} : vector<8x3584xf32> to vector<8x128xf32>
    %135 = vector.extract_strided_slice %38 {offsets = [0, 3072], sizes = [8, 128], strides = [1, 1]} : vector<8x3584xf32> to vector<8x128xf32>
    %136 = arith.mulf %134, %135 : vector<8x128xf32>
    %137 = arith.addf %133, %136 : vector<8x128xf32>
    %138 = vector.extract_strided_slice %5 {offsets = [0, 3200], sizes = [8, 128], strides = [1, 1]} : vector<8x3584xf32> to vector<8x128xf32>
    %139 = vector.extract_strided_slice %38 {offsets = [0, 3200], sizes = [8, 128], strides = [1, 1]} : vector<8x3584xf32> to vector<8x128xf32>
    %140 = arith.mulf %138, %139 : vector<8x128xf32>
    %141 = arith.addf %137, %140 : vector<8x128xf32>
    %142 = vector.extract_strided_slice %5 {offsets = [0, 3328], sizes = [8, 128], strides = [1, 1]} : vector<8x3584xf32> to vector<8x128xf32>
    %143 = vector.extract_strided_slice %38 {offsets = [0, 3328], sizes = [8, 128], strides = [1, 1]} : vector<8x3584xf32> to vector<8x128xf32>
    %144 = arith.mulf %142, %143 : vector<8x128xf32>
    %145 = arith.addf %141, %144 : vector<8x128xf32>
    %146 = vector.extract_strided_slice %5 {offsets = [0, 3456], sizes = [8, 128], strides = [1, 1]} : vector<8x3584xf32> to vector<8x128xf32>
    %147 = vector.extract_strided_slice %38 {offsets = [0, 3456], sizes = [8, 128], strides = [1, 1]} : vector<8x3584xf32> to vector<8x128xf32>
    %148 = arith.mulf %146, %147 : vector<8x128xf32>
    %149 = arith.addf %145, %148 : vector<8x128xf32>
    %cst_21 = arith.constant dense<0.000000e+00> : vector<128xf32>
    %150 = vector.multi_reduction <add>, %149, %cst_21 [0] : vector<8x128xf32> to vector<128xf32>
    %151 = vector.shape_cast %150 : vector<128xf32> to vector<1x128xf32>
    %152 = vector.broadcast %6 : f32 to vector<1x128xf32>
    %153 = arith.addf %151, %152 : vector<1x128xf32>
    %c0_22 = arith.constant 0 : index
    %c0_23 = arith.constant 0 : index
    %c0_24 = arith.constant 0 : index
    %154 = vector.load %arg7[%c0_22, %c0_23, %c0_24] : memref<1x1x128xf32, #tpu.memory_space<vmem>>, vector<1x1x128xf32>
    %155 = vector.shape_cast %154 : vector<1x1x128xf32> to vector<1x128xf32>
    %156 = vector.shape_cast %153 : vector<1x128xf32> to vector<1x1x128xf32>
    tpu.vector_store %arg7[%c0_22, %c0_23, %c0_24], %156 {strides = array<i32>} : memref<1x1x128xf32, #tpu.memory_space<vmem>>, vector<1x1x128xf32>,
    return
  }
  func.func @transform_0(%arg0: i32) -> (i32, i32, i32) {
    %c0_i32 = arith.constant 0 : i32
    %c0_i32_0 = arith.constant 0 : i32
    %c0_i32_1 = arith.constant 0 : i32
    return %arg0, %c0_i32, %c0_i32_0 : i32, i32, i32
  }
  func.func @transform_1(%arg0: i32) -> (i32, i32) {
    %c0_i32 = arith.constant 0 : i32
    %c0_i32_0 = arith.constant 0 : i32
    %c0_i32_1 = arith.constant 0 : i32
    return %c0_i32, %c0_i32_0 : i32, i32
  }
  func.func @transform_2(%arg0: i32) -> (i32, i32, i32) {
    %c0_i32 = arith.constant 0 : i32
    %c0_i32_0 = arith.constant 0 : i32
    %c0_i32_1 = arith.constant 0 : i32
    %c0_i32_2 = arith.constant 0 : i32
    return %c0_i32, %c0_i32_0, %c0_i32_1 : i32, i32, i32
  }
  func.func @transform_3(%arg0: i32) -> (i32, i32) {
    %c0_i32 = arith.constant 0 : i32
    %c0_i32_0 = arith.constant 0 : i32
    %c0_i32_1 = arith.constant 0 : i32
    return %c0_i32, %c0_i32_0 : i32, i32
  }
  func.func @transform_4(%arg0: i32) -> (i32, i32) {
    %c0_i32 = arith.constant 0 : i32
    %c0_i32_0 = arith.constant 0 : i32
    %c0_i32_1 = arith.constant 0 : i32
    return %c0_i32, %c0_i32_0 : i32, i32
  }
  func.func @transform_5(%arg0: i32) -> (i32, i32) {
    %c0_i32 = arith.constant 0 : i32
    %c0_i32_0 = arith.constant 0 : i32
    %c0_i32_1 = arith.constant 0 : i32
    return %c0_i32, %c0_i32_0 : i32, i32
  }
  func.func @transform_6(%arg0: i32) -> (i32, i32, i32) {
    %c0_i32 = arith.constant 0 : i32
    %c0_i32_0 = arith.constant 0 : i32
    %c0_i32_1 = arith.constant 0 : i32
    return %arg0, %c0_i32, %c0_i32_0 : i32, i32, i32
  }
}

</mosaic_0001>

<bundles_post_ra>
// kernel: tpu_custom_call.1
= control target key start
LH: loop header
LB: loop body
LE: loop exit
PB: predicated region body
PF: predicated region fallthrough
CT: control target
= control target key end

     0   :  { %12 = vsyncpa [#allocation4], 0  ;;  %s4375_s0 = inlined_call_operand.hbm [shape: f32[1,1,4096], index: 0, kind: input, shape index: {}]   ;;  %s4376_s1 = inlined_call_operand.vmem [shape: f32[16,4], index: 1, kind: input, shape index: {}]   ;;  %s4377_s2 = inlined_call_operand.vmem [shape: f32[3,8,16], index: 2, kind: input, shape index: {}]   ;;  %s4378_s3 = inlined_call_operand.vmem [shape: f32[8,1], index: 3, kind: input, shape index: {}]   ;;  %s4379_s4 = inlined_call_operand.hbm [shape: f32[8,3584], index: 4, kind: input, shape index: {}]   ;;  %s4380_s5 = inlined_call_operand.<no memory space> [shape: f32[1,1], index: 5, kind: input, shape index: {}]   ;;  %s4381_s6 = inlined_call_operand.hbm [shape: f32[1,1,128], index: 6, kind: output, shape index: {}]  }
   0x1   :  { %13 = vsyncpa [#allocation7], 0 }
   0x2   :  { %14 = vsyncpa [#allocation5], 0  ;;  %s20_s23 = sshll.u32 %s4375_s0, 4  ;;  %s3395_s24 = smov [#allocation3]   ;;  %s21_s23 = int_to_ptr.hbm [resolvable:$true] %s20_s23 }
   0x3   :  { %s22_s25 = sshll.u32 %s3395_s24, 4  ;;  %s37_s28 = sshll.u32 %s4379_s4, 4  ;;  %s23_s25 = int_to_ptr.vmem [resolvable:$true] %s22_s25  ;;  %s38_s28 = int_to_ptr.hbm [resolvable:$true] %s37_s28 }
   0x4   :  { %25 = dma.hbm_to_vmem [thread:$0]  %s21_s23, 512, %s23_s25, [#allocation4]  }
   0x5   :  { %s3396_s29 = smov [#allocation6]  }
   0x6   :  { %s39_s30 = sshll.u32 %s3396_s29, 4  ;;  %s40_s30 = int_to_ptr.vmem [resolvable:$true] %s39_s30 }
   0x7   :  { %42 = dma.hbm_to_vmem [thread:$0]  %s38_s28, 3584, %s40_s30, [#allocation7]  }
   0x8   :  { %3389 = dma.done.wait [#allocation4], 512  }
   0x9   :  { %3390 = vsyncadd [#allocation4], 4294966784 }
   0xa   :  { %3391 = dma.done.wait [#allocation7], 3584  }
   0xb   :  { %3392 = vsyncadd [#allocation7], 4294963712  ;;  %vm160_vm0 = vcmask 1040384   ;;  %v53_v0 = vld [vmem:[#allocation3] sm:$0xff]  ;;  %vm191_vm1 = vcmask 1041408   ;;  %vm222_vm2 = vcmask 1042432  }
   0xc   :  { %vm260_vm3 = vcmask 1043456   ;;  %vm253_vm4 = vcmask 31744   ;;  %v96_v1 = vperm.slane %v53_v0, 0  ;;  %v97_v2 = vperm.slane %v53_v0, 1  ;;  %v3440_v5 = vld [vmem:[#allocation3 + $0x8] sm:$0xff]  ;;  %v3457_v22 = vld [vmem:[%s4376_s1] sm:$0xff] }
   0xd   :  { %v98_v3 = vperm.slane %v53_v0, 2  ;;  %v99_v4 = vperm.slane %v53_v0, 3  ;;  %v100_v6 = vperm.slane %v53_v0, 4  ;;  %v101_v7 = vperm.slane %v53_v0, 5  ;;  %v3504_v48 = vld [vmem:[%s4376_s1 + $0x8] sm:$0xff]  ;;  %v55_v56 = vld [vmem:[#allocation3 + $0x10] sm:$0xff] }
   0xe   :  { %v102_v8 = vperm.slane %v53_v0, 6  ;;  %v103_v9 = vperm.slane %v53_v0, 7  ;;  %v161_v10 = vsel %vm160_vm0, %v96_v1, %v97_v2  ;;  %v104_v13 = vperm.slane %v3440_v5, 0  ;;  %s3398_s16 = smov [#allocation8]   ;;  %s3127_s20 = sshll.u32 %s4381_s6, 4  ;;  %s3128_s20 = int_to_ptr.hbm [resolvable:$true] %s3127_s20 }
   0xf   :  { %v162_v11 = vsel %vm160_vm0, %v97_v2, %v98_v3  ;;  %v163_v12 = vsel %vm160_vm0, %v98_v3, %v99_v4  ;;  %v192_v14 = vsel %vm191_vm1, %v161_v10, %v98_v3  ;;  %v164_v17 = vsel %vm160_vm0, %v99_v4, %v100_v6  ;;  %s3125_s17 = sshll.u32 %s3398_s16, 4  ;;  %s3126_s17 = int_to_ptr.vmem [resolvable:$true] %s3125_s17 }
  0x10   :  { %v193_v15 = vsel %vm191_vm1, %v162_v11, %v99_v4  ;;  %v194_v16 = vsel %vm191_vm1, %v163_v12, %v100_v6  ;;  %v223_v18 = vsel %vm222_vm2, %v192_v14, 1.0  ;;  %v195_v21 = vsel %vm191_vm1, %v164_v17, %v101_v7 }
  0x11   :  { %v224_v19 = vsel %vm222_vm2, %v193_v15, 1.0  ;;  %v225_v20 = vsel %vm222_vm2, %v194_v16, 1.0  ;;  %3138 = vmatpush.msk.msra.mxu0 %vm260_vm3, %v223_v18  ;;  %v226_v23 = vsel %vm222_vm2, %v195_v21, 1.0  ;;  %v165_v24 = vsel %vm160_vm0, %v100_v6, %v101_v7 }
  0x12   :  { %3141 = vmatpush.msk.msra.mxu1 %vm260_vm3, %v224_v19  ;;  %v105_v25 = vperm.slane %v3440_v5, 1  ;;  %v168_v26 = vsel %vm160_vm0, %v103_v9, %v104_v13  ;;  %3144 = vmatpush.msk.msra.mxu2 %vm260_vm3, %v225_v20  ;;  %v196_v27 = vsel %vm191_vm1, %v165_v24, %v102_v8  ;;  %v166_v28 = vsel %vm160_vm0, %v101_v7, %v102_v8 }
  0x13   :  { %3147 = vmatpush.msk.msra.mxu3 %vm260_vm3, %v226_v23  ;;  %v167_v29 = vsel %vm160_vm0, %v102_v8, %v103_v9  ;;  %v106_v30 = vperm.slane %v3440_v5, 2  ;;  %3139 = vmatmul.msk.f32.vlgmr.msra.gmra.mxu0 %vm253_vm4, %v3457_v22  ;;  %v227_v31 = vsel %vm222_vm2, %v196_v27, 1.0  ;;  %v197_v33 = vsel %vm191_vm1, %v166_v28, %v103_v9 }
  0x14   :  { %3142 = vmatmul.msk.f32.vlgmr.msra.gmra.mxu1 %vm253_vm4, %v3457_v22  ;;  %v199_v32 = vsel %vm191_vm1, %v168_v26, %v105_v25  ;;  %v198_v34 = vsel %vm191_vm1, %v167_v29, %v104_v13  ;;  %3145 = vmatmul.msk.f32.vlgmr.msra.gmra.mxu2 %vm253_vm4, %v3457_v22  ;;  %v228_v36 = vsel %vm222_vm2, %v197_v33, 1.0  ;;  %v169_v38 = vsel %vm160_vm0, %v104_v13, %v105_v25  ;;  %v3589_v26 = vld [vmem:[#allocation3 + $0x18] sm:$0xff] }
  0x15   :  { %3148 = vmatmul.msk.f32.vlgmr.msra.gmra.mxu3 %vm253_vm4, %v3457_v22  ;;  %v230_v35 = vsel %vm222_vm2, %v199_v32, 1.0  ;;  %v229_v37 = vsel %vm222_vm2, %v198_v34, 1.0  ;;  %3150 = vmatpush.msk.msrb.mxu0 %vm260_vm3, %v227_v31  ;;  %v200_v39 = vsel %vm191_vm1, %v169_v38, %v106_v30  ;;  %v107_v40 = vperm.slane %v3440_v5, 3 }
  0x16   :  { %3159 = vmatpush.msk.msrb.mxu3 %vm260_vm3, %v230_v35  ;;  %v108_v41 = vperm.slane %v3440_v5, 4  ;;  %v109_v42 = vperm.slane %v3440_v5, 5  ;;  %3153 = vmatpush.msk.msrb.mxu1 %vm260_vm3, %v228_v36  ;;  %v231_v43 = vsel %vm222_vm2, %v200_v39, 1.0  ;;  %v170_v44 = vsel %vm160_vm0, %v105_v25, %v106_v30 }
  0x17   :  { %3156 = vmatpush.msk.msrb.mxu2 %vm260_vm3, %v229_v37  ;;  %3162 = vmatpush.msk.msra.mxu0 %vm260_vm3, %v231_v43  ;;  %v201_v46 = vsel %vm191_vm1, %v170_v44, %v107_v40  ;;  %v171_v47 = vsel %vm160_vm0, %v106_v30, %v107_v40  ;;  %v110_v54 = vperm.slane %v3440_v5, 6  ;;  %v111_v57 = vperm.slane %v3440_v5, 7 }
  0x18   :  { %v172_v45 = vsel %vm160_vm0, %v107_v40, %v108_v41  ;;  %v232_v50 = vsel %vm222_vm2, %v201_v46, 1.0  ;;  %v202_v51 = vsel %vm191_vm1, %v171_v47, %v108_v41  ;;  %v173_v55 = vsel %vm160_vm0, %v108_v41, %v109_v42 }
  0x19   :  { %v203_v49 = vsel %vm191_vm1, %v172_v45, %v109_v42  ;;  %3165 = vmatpush.msk.msra.mxu1 %vm260_vm3, %v232_v50  ;;  %v233_v53 = vsel %vm222_vm2, %v202_v51, 1.0  ;;  %v112_v58 = vperm.slane %v55_v56, 0  ;;  %v113_v59 = vperm.slane %v55_v56, 1 }
  0x1a   :  { %v234_v52 = vsel %vm222_vm2, %v203_v49, 1.0  ;;  %3168 = vmatpush.msk.msra.mxu2 %vm260_vm3, %v233_v53  ;;  %v174_v60 = vsel %vm160_vm0, %v109_v42, %v110_v54  ;;  %v175_v61 = vsel %vm160_vm0, %v110_v54, %v111_v57  ;;  %v204_v62 = vsel %vm191_vm1, %v173_v55, %v110_v54 }
  0x1b   :  { %3171 = vmatpush.msk.msra.mxu3 %vm260_vm3, %v234_v52  ;;  %3140 = vmatmul.msk.f32.gmra.mxu0 %vm253_vm4, %v3504_v48  ;;  %v176_v63 = vsel %vm160_vm0, %v111_v57, %v112_v58  ;;  %v205_v1 = vsel %vm191_vm1, %v174_v60, %v111_v57  ;;  %v206_v2 = vsel %vm191_vm1, %v175_v61, %v112_v58  ;;  %v235_v3 = vsel %vm222_vm2, %v204_v62, 1.0 }
  0x1c   :  { %3143 = vmatmul.msk.f32.gmra.mxu1 %vm253_vm4, %v3504_v48  ;;  %3146 = vmatmul.msk.f32.gmra.mxu2 %vm253_vm4, %v3504_v48  ;;  %v207_v0 = vsel %vm191_vm1, %v176_v63, %v113_v59  ;;  %v236_v5 = vsel %vm222_vm2, %v205_v1, 1.0  ;;  %v237_v6 = vsel %vm222_vm2, %v206_v2, 1.0  ;;  %v114_v7 = vperm.slane %v55_v56, 2 }
  0x1d   :  { %3149 = vmatmul.msk.f32.gmra.mxu3 %vm253_vm4, %v3504_v48  ;;  %v238_v4 = vsel %vm222_vm2, %v207_v0, 1.0  ;;  %v177_v8 = vsel %vm160_vm0, %v112_v58, %v113_v59  ;;  %v115_v9 = vperm.slane %v55_v56, 3  ;;  %v116_v10 = vperm.slane %v55_v56, 4 }
  0x1e   :  { %v117_v11 = vperm.slane %v55_v56, 5  ;;  %v178_v12 = vsel %vm160_vm0, %v113_v59, %v114_v7  ;;  %v208_v15 = vsel %vm191_vm1, %v177_v8, %v114_v7  ;;  %v118_v24 = vperm.slane %v55_v56, 6 }
  0x1f   :  { %v180_v13 = vsel %vm160_vm0, %v115_v9, %v116_v10  ;;  %v179_v14 = vsel %vm160_vm0, %v114_v7, %v115_v9  ;;  %v209_v17 = vsel %vm191_vm1, %v178_v12, %v115_v9  ;;  %v239_v19 = vsel %vm222_vm2, %v208_v15, 1.0 }
  0x20   :  { %v211_v16 = vsel %vm191_vm1, %v180_v13, %v117_v11  ;;  %v210_v18 = vsel %vm191_vm1, %v179_v14, %v116_v10  ;;  %v240_v21 = vsel %vm222_vm2, %v209_v17, 1.0  ;;  %v181_v25 = vsel %vm160_vm0, %v116_v10, %v117_v11 }
  0x21   :  { %v242_v20 = vsel %vm222_vm2, %v211_v16, 1.0  ;;  %v241_v23 = vsel %vm222_vm2, %v210_v18, 1.0  ;;  %v119_v27 = vperm.slane %v55_v56, 7  ;;  %v120_v28 = vperm.slane %v3589_v26, 0 }
  0x22   :  { %v121_v29 = vperm.slane %v3589_v26, 1  ;;  %v182_v30 = vsel %vm160_vm0, %v117_v11, %v118_v24  ;;  %v212_v32 = vsel %vm191_vm1, %v181_v25, %v118_v24  ;;  %v122_v41 = vperm.slane %v3589_v26, 2 }
  0x23   :  { %3151 = vmatmul.msk.f32.vlgmr.msrb.gmra.mxu0 %vm253_vm4, %v3457_v22  ;;  %v183_v31 = vsel %vm160_vm0, %v118_v24, %v119_v27  ;;  %v184_v33 = vsel %vm160_vm0, %v119_v27, %v120_v28  ;;  %v213_v35 = vsel %vm191_vm1, %v182_v30, %v119_v27  ;;  %v243_v37 = vsel %vm222_vm2, %v212_v32, 1.0 }
  0x24   :  { %3154 = vmatmul.msk.f32.vlgmr.msrb.gmra.mxu1 %vm253_vm4, %v3457_v22  ;;  %3157 = vmatmul.msk.f32.vlgmr.msrb.gmra.mxu2 %vm253_vm4, %v3457_v22  ;;  %v215_v34 = vsel %vm191_vm1, %v184_v33, %v121_v29  ;;  %v214_v36 = vsel %vm191_vm1, %v183_v31, %v120_v28  ;;  %v244_v39 = vsel %vm222_vm2, %v213_v35, 1.0  ;;  %v185_v42 = vsel %vm160_vm0, %v120_v28, %v121_v29 }
  0x25   :  { %3160 = vmatmul.msk.f32.vlgmr.msrb.gmra.mxu3 %vm253_vm4, %v3457_v22  ;;  %3174 = vmatpush.msk.msrb.mxu0 %vm260_vm3, %v235_v3  ;;  %v246_v38 = vsel %vm222_vm2, %v215_v34, 1.0  ;;  %v245_v40 = vsel %vm222_vm2, %v214_v36, 1.0  ;;  %v123_v43 = vperm.slane %v3589_v26, 3  ;;  %v124_v44 = vperm.slane %v3589_v26, 4 }
  0x26   :  { %3183 = vmatpush.msk.msrb.mxu3 %vm260_vm3, %v238_v4  ;;  %3177 = vmatpush.msk.msrb.mxu1 %vm260_vm3, %v236_v5  ;;  %v125_v45 = vperm.slane %v3589_v26, 5  ;;  %v186_v46 = vsel %vm160_vm0, %v121_v29, %v122_v41  ;;  %v216_v50 = vsel %vm191_vm1, %v185_v42, %v122_v41  ;;  %v156_v58 = vperm.slane %v3589_v26, 6 }
  0x27   :  { %3180 = vmatpush.msk.msrb.mxu2 %vm260_vm3, %v237_v6  ;;  %v188_v47 = vsel %vm160_vm0, %v123_v43, %v124_v44  ;;  %v187_v49 = vsel %vm160_vm0, %v122_v41, %v123_v43  ;;  %v217_v52 = vsel %vm191_vm1, %v186_v46, %v123_v43  ;;  %v247_v54 = vsel %vm222_vm2, %v216_v50, 1.0 }
  0x28   :  { %v219_v51 = vsel %vm191_vm1, %v188_v47, %v125_v45  ;;  %v218_v53 = vsel %vm191_vm1, %v187_v49, %v124_v44  ;;  %v248_v56 = vsel %vm222_vm2, %v217_v52, 1.0  ;;  %v189_v59 = vsel %vm160_vm0, %v124_v44, %v125_v45 }
  0x29   :  { %v250_v55 = vsel %vm222_vm2, %v219_v51, 1.0  ;;  %v249_v57 = vsel %vm222_vm2, %v218_v53, 1.0  ;;  %v220_v60 = vsel %vm191_vm1, %v189_v59, %v156_v58  ;;  %v158_v62 = vperm.slane %v3589_v26, 7 }
  0x2a   :  { %v251_v61 = vsel %vm222_vm2, %v220_v60, 1.0  ;;  %v190_v63 = vsel %vm160_vm0, %v125_v45, %v156_v58  ;;  %vm1221_vm7 = vcmask 130048  }
  0x2b   :  { %3152 = vmatmul.msk.f32.gmra.mxu0 %vm253_vm4, %v3504_v48  ;;  %v221_v2 = vsel %vm191_vm1, %v190_v63, %v158_v62 }
  0x2c   :  { %3155 = vmatmul.msk.f32.gmra.mxu1 %vm253_vm4, %v3504_v48  ;;  %3158 = vmatmul.msk.f32.gmra.mxu2 %vm253_vm4, %v3504_v48  ;;  %v252_v3 = vsel %vm222_vm2, %v221_v2, 1.0 }
  0x2d   :  { %3161 = vmatmul.msk.f32.gmra.mxu3 %vm253_vm4, %v3504_v48 }
  0x33   :  { %3163 = vmatmul.msk.f32.vlgmr.msra.gmra.mxu0 %vm253_vm4, %v3457_v22 }
  0x34   :  { %3166 = vmatmul.msk.f32.vlgmr.msra.gmra.mxu1 %vm253_vm4, %v3457_v22  ;;  %3169 = vmatmul.msk.f32.vlgmr.msra.gmra.mxu2 %vm253_vm4, %v3457_v22 }
  0x35   :  { %3172 = vmatmul.msk.f32.vlgmr.msra.gmra.mxu3 %vm253_vm4, %v3457_v22  ;;  %3186 = vmatpush.msk.msra.mxu0 %vm260_vm3, %v239_v19 }
  0x36   :  { %3195 = vmatpush.msk.msra.mxu3 %vm260_vm3, %v242_v20  ;;  %3189 = vmatpush.msk.msra.mxu1 %vm260_vm3, %v240_v21 }
  0x37   :  { %3192 = vmatpush.msk.msra.mxu2 %vm260_vm3, %v241_v23 }
  0x3b   :  { %3164 = vmatmul.msk.f32.gmra.mxu0 %vm253_vm4, %v3504_v48 }
  0x3c   :  { %3167 = vmatmul.msk.f32.gmra.mxu1 %vm253_vm4, %v3504_v48  ;;  %3170 = vmatmul.msk.f32.gmra.mxu2 %vm253_vm4, %v3504_v48 }
  0x3d   :  { %3173 = vmatmul.msk.f32.gmra.mxu3 %vm253_vm4, %v3504_v48 }
  0x43   :  { %3175 = vmatmul.msk.f32.vlgmr.msrb.gmra.mxu0 %vm253_vm4, %v3457_v22 }
  0x44   :  { %3178 = vmatmul.msk.f32.vlgmr.msrb.gmra.mxu1 %vm253_vm4, %v3457_v22  ;;  %3181 = vmatmul.msk.f32.vlgmr.msrb.gmra.mxu2 %vm253_vm4, %v3457_v22 }
  0x45   :  { %3184 = vmatmul.msk.f32.vlgmr.msrb.gmra.mxu3 %vm253_vm4, %v3457_v22  ;;  %3198 = vmatpush.msk.msrb.mxu0 %vm260_vm3, %v243_v37 }
  0x46   :  { %3207 = vmatpush.msk.msrb.mxu3 %vm260_vm3, %v246_v38  ;;  %3201 = vmatpush.msk.msrb.mxu1 %vm260_vm3, %v244_v39 }
  0x47   :  { %3204 = vmatpush.msk.msrb.mxu2 %vm260_vm3, %v245_v40 }
  0x4b   :  { %3176 = vmatmul.msk.f32.gmra.mxu0 %vm253_vm4, %v3504_v48 }
  0x4c   :  { %3179 = vmatmul.msk.f32.gmra.mxu1 %vm253_vm4, %v3504_v48  ;;  %3182 = vmatmul.msk.f32.gmra.mxu2 %vm253_vm4, %v3504_v48 }
  0x4d   :  { %3185 = vmatmul.msk.f32.gmra.mxu3 %vm253_vm4, %v3504_v48 }
  0x53   :  { %3187 = vmatmul.msk.f32.vlgmr.msra.gmra.mxu0 %vm253_vm4, %v3457_v22 }
  0x54   :  { %3190 = vmatmul.msk.f32.vlgmr.msra.gmra.mxu1 %vm253_vm4, %v3457_v22  ;;  %3193 = vmatmul.msk.f32.vlgmr.msra.gmra.mxu2 %vm253_vm4, %v3457_v22 }
  0x55   :  { %3196 = vmatmul.msk.f32.vlgmr.msra.gmra.mxu3 %vm253_vm4, %v3457_v22  ;;  %3210 = vmatpush.msk.msra.mxu0 %vm260_vm3, %v247_v54 }
  0x56   :  { %3219 = vmatpush.msk.msra.mxu3 %vm260_vm3, %v250_v55  ;;  %3213 = vmatpush.msk.msra.mxu1 %vm260_vm3, %v248_v56 }
  0x57   :  { %3216 = vmatpush.msk.msra.mxu2 %vm260_vm3, %v249_v57 }
  0x5b   :  { %3188 = vmatmul.msk.f32.gmra.mxu0 %vm253_vm4, %v3504_v48 }
  0x5c   :  { %3191 = vmatmul.msk.f32.gmra.mxu1 %vm253_vm4, %v3504_v48  ;;  %3194 = vmatmul.msk.f32.gmra.mxu2 %vm253_vm4, %v3504_v48 }
  0x5d   :  { %3197 = vmatmul.msk.f32.gmra.mxu3 %vm253_vm4, %v3504_v48 }
  0x63   :  { %3199 = vmatmul.msk.f32.vlgmr.msrb.gmra.mxu0 %vm253_vm4, %v3457_v22 }
  0x64   :  { %3202 = vmatmul.msk.f32.vlgmr.msrb.gmra.mxu1 %vm253_vm4, %v3457_v22  ;;  %3205 = vmatmul.msk.f32.vlgmr.msrb.gmra.mxu2 %vm253_vm4, %v3457_v22 }
  0x65   :  { %3208 = vmatmul.msk.f32.vlgmr.msrb.gmra.mxu3 %vm253_vm4, %v3457_v22  ;;  %3222 = vmatpush.msk.msrb.mxu0 %vm260_vm3, %v251_v61 }
  0x66   :  { %3225 = vmatpush.msk.msrb.mxu1 %vm260_vm3, %v252_v3 }
  0x6b   :  { %3200 = vmatmul.msk.f32.gmra.mxu0 %vm253_vm4, %v3504_v48 }
  0x6c   :  { %3203 = vmatmul.msk.f32.gmra.mxu1 %vm253_vm4, %v3504_v48  ;;  %3206 = vmatmul.msk.f32.gmra.mxu2 %vm253_vm4, %v3504_v48 }
  0x6d   :  { %3209 = vmatmul.msk.f32.gmra.mxu3 %vm253_vm4, %v3504_v48 }
  0x73   :  { %3211 = vmatmul.msk.f32.vlgmr.msra.gmra.mxu0 %vm253_vm4, %v3457_v22 }
  0x74   :  { %3214 = vmatmul.msk.f32.vlgmr.msra.gmra.mxu1 %vm253_vm4, %v3457_v22  ;;  %3217 = vmatmul.msk.f32.vlgmr.msra.gmra.mxu2 %vm253_vm4, %v3457_v22 }
  0x75   :  { %3220 = vmatmul.msk.f32.vlgmr.msra.gmra.mxu3 %vm253_vm4, %v3457_v22 }
  0x7b   :  { %3212 = vmatmul.msk.f32.gmra.mxu0 %vm253_vm4, %v3504_v48 }
  0x7c   :  { %3215 = vmatmul.msk.f32.gmra.mxu1 %vm253_vm4, %v3504_v48  ;;  %3218 = vmatmul.msk.f32.gmra.mxu2 %vm253_vm4, %v3504_v48 }
  0x7d   :  { %3221 = vmatmul.msk.f32.gmra.mxu3 %vm253_vm4, %v3504_v48 }
  0x83   :  { %3223 = vmatmul.msk.f32.vlgmr.msrb.gmra.mxu0 %vm253_vm4, %v3457_v22 }
  0x84   :  { %3226 = vmatmul.msk.f32.vlgmr.msrb.gmra.mxu1 %vm253_vm4, %v3457_v22  ;;  %v3722_v22 = vld [vmem:[%s4377_s2 + $0x8] sm:$0xff] }
  0x8b   :  { %3224 = vmatmul.msk.f32.gmra.mxu0 %vm253_vm4, %v3504_v48 }
  0x8c   :  { %3227 = vmatmul.msk.f32.gmra.mxu1 %vm253_vm4, %v3504_v48 }
  0x90   :  { %v3703_v0 = vpop.f32.mrf.mxu0 }
  0x91   :  { %v391_v1 = vpop.f32.mrf.mxu1 }
  0x92   :  { %v1102_v4 = vmul.f32 0.1, %v391_v1  ;;  %vm1042_vm5 = vcmp.gt.f32.partialorder %v391_v1, 0.0 }
  0x94   :  { %v3714_v11 = vsel %vm1042_vm5, %v391_v1, %v1102_v4 }
  0x97   :  { %v414_v5 = vpop.f32.mrf.mxu2 }
  0x98   :  { %v437_v6 = vpop.f32.mrf.mxu3  ;;  %v3710_v7 = vpop.f32.mrf.mxu0  ;;  %v1103_v12 = vmul.f32 0.1, %v414_v5  ;;  %vm1043_vm8 = vcmp.gt.f32.partialorder %v414_v5, 0.0 }
  0x99   :  { %v394_v8 = vpop.f32.mrf.mxu1  ;;  %v1104_v13 = vmul.f32 0.1, %v437_v6  ;;  %vm1044_vm11 = vcmp.gt.f32.partialorder %v437_v6, 0.0 }
  0x9a   :  { %v1132_v9 = vmul.f32 0.1, %v394_v8  ;;  %vm1072_vm6 = vcmp.gt.f32.partialorder %v394_v8, 0.0  ;;  %v3731_v21 = vsel %vm1043_vm8, %v414_v5, %v1103_v12 }
  0x9b   :  { %v3735_v23 = vsel %vm1044_vm11, %v437_v6, %v1104_v13 }
  0x9c   :  { %v3712_v10 = vsel %vm1072_vm6, %v394_v8, %v1132_v9 }
  0x9d   :  { %1239 = vmatpush.msrb.mxu2 %v3712_v10 }
  0x9f   :  { %1240 = vmatpush.msrb.mxu2 %v3714_v11  ;;  %v417_v14 = vpop.f32.mrf.mxu2 }
  0xa0   :  { %v440_v15 = vpop.f32.mrf.mxu3  ;;  %3228 = vmatmul.msk.f32.vlgmr.msrb.gmra.mxu2 %vm1221_vm7, %v3722_v22  ;;  %v1133_v16 = vmul.f32 0.1, %v417_v14  ;;  %v460_v17 = vpop.f32.mrf.mxu0  ;;  %vm1073_vm9 = vcmp.gt.f32.partialorder %v417_v14, 0.0 }
  0xa1   :  { %v1134_v48 = vmul.f32 0.1, %v440_v15  ;;  %v483_v18 = vpop.f32.mrf.mxu1  ;;  %vm1074_vm10 = vcmp.gt.f32.partialorder %v440_v15, 0.0  ;;  %v1105_v27 = vmul.f32 0.1, %v460_v17  ;;  %vm1045_vm15 = vcmp.gt.f32.partialorder %v460_v17, 0.0 }
  0xa2   :  { %v3727_v19 = vsel %vm1073_vm9, %v417_v14, %v1133_v16  ;;  %v1106_v24 = vmul.f32 0.1, %v483_v18  ;;  %vm1046_vm12 = vcmp.gt.f32.partialorder %v483_v18, 0.0 }
  0xa3   :  { %v3729_v20 = vsel %vm1074_vm10, %v440_v15, %v1134_v48  ;;  %1259 = vmatpush.msrb.mxu3 %v3727_v19  ;;  %v3751_v35 = vsel %vm1045_vm15, %v460_v17, %v1105_v27 }
  0xa4   :  { %1279 = vmatpush.msra.mxu2 %v3729_v20  ;;  %v3747_v34 = vsel %vm1046_vm12, %v483_v18, %v1106_v24 }
  0xa5   :  { %1260 = vmatpush.msrb.mxu3 %v3731_v21 }
  0xa6   :  { %1280 = vmatpush.msra.mxu2 %v3735_v23  ;;  %3229 = vmatmul.msk.f32.vlgmr.msrb.gmra.mxu3 %vm1221_vm7, %v3722_v22 }
  0xa7   :  { %v506_v25 = vpop.f32.mrf.mxu2 }
  0xa8   :  { %v529_v26 = vpop.f32.mrf.mxu3  ;;  %3230 = vmatmul.msk.f32.vlgmr.msra.gmra.mxu2 %vm1221_vm7, %v3722_v22  ;;  %v463_v28 = vpop.f32.mrf.mxu0  ;;  %v1107_v36 = vmul.f32 0.1, %v506_v25  ;;  %vm1047_vm0 = vcmp.gt.f32.partialorder %v506_v25, 0.0 }
  0xa9   :  { %v486_v29 = vpop.f32.mrf.mxu1  ;;  %v1135_v30 = vmul.f32 0.1, %v463_v28  ;;  %vm1075_vm13 = vcmp.gt.f32.partialorder %v463_v28, 0.0  ;;  %v1108_v37 = vmul.f32 0.1, %v529_v26  ;;  %vm1048_vm3 = vcmp.gt.f32.partialorder %v529_v26, 0.0 }
  0xaa   :  { %v1136_v31 = vmul.f32 0.1, %v486_v29  ;;  %vm1076_vm14 = vcmp.gt.f32.partialorder %v486_v29, 0.0  ;;  %v3763_v46 = vsel %vm1047_vm0, %v506_v25, %v1107_v36 }
  0xab   :  { %v3743_v32 = vsel %vm1075_vm13, %v463_v28, %v1135_v30  ;;  %v3767_v47 = vsel %vm1048_vm3, %v529_v26, %v1108_v37 }
  0xac   :  { %v3745_v33 = vsel %vm1076_vm14, %v486_v29, %v1136_v31  ;;  %1299 = vmatpush.msra.mxu3 %v3743_v32 }
  0xad   :  { %1319 = vmatpush.msra.mxu0 %v3745_v33 }
  0xae   :  { %1300 = vmatpush.msra.mxu3 %v3751_v35 }
  0xaf   :  { %1320 = vmatpush.msra.mxu0 %v3747_v34  ;;  %v509_v38 = vpop.f32.mrf.mxu2  ;;  %3231 = vmatmul.msk.f32.vlgmr.msra.gmra.mxu3 %vm1221_vm7, %v3722_v22 }
  0xb0   :  { %v532_v39 = vpop.f32.mrf.mxu3  ;;  %3232 = vmatmul.msk.f32.vlgmr.msra.gmra.mxu0 %vm1221_vm7, %v3722_v22  ;;  %v1137_v40 = vmul.f32 0.1, %v509_v38  ;;  %v552_v42 = vpop.f32.mrf.mxu0  ;;  %vm1077_vm1 = vcmp.gt.f32.partialorder %v509_v38, 0.0 }
  0xb1   :  { %v1138_v41 = vmul.f32 0.1, %v532_v39  ;;  %v575_v43 = vpop.f32.mrf.mxu1  ;;  %vm1078_vm2 = vcmp.gt.f32.partialorder %v532_v39, 0.0  ;;  %v1109_v52 = vmul.f32 0.1, %v552_v42  ;;  %vm1049_vm8 = vcmp.gt.f32.partialorder %v552_v42, 0.0 }
  0xb2   :  { %v3759_v44 = vsel %vm1077_vm1, %v509_v38, %v1137_v40  ;;  %v1110_v49 = vmul.f32 0.1, %v575_v43  ;;  %vm1050_vm4 = vcmp.gt.f32.partialorder %v575_v43, 0.0 }
  0xb3   :  { %v3761_v45 = vsel %vm1078_vm2, %v532_v39, %v1138_v41  ;;  %1339 = vmatpush.msra.mxu1 %v3759_v44  ;;  %v3783_v60 = vsel %vm1049_vm8, %v552_v42, %v1109_v52 }
  0xb4   :  { %1359 = vmatpush.msrb.mxu2 %v3761_v45  ;;  %v3779_v59 = vsel %vm1050_vm4, %v575_v43, %v1110_v49 }
  0xb5   :  { %1340 = vmatpush.msra.mxu1 %v3763_v46 }
  0xb6   :  { %1360 = vmatpush.msrb.mxu2 %v3767_v47  ;;  %3233 = vmatmul.msk.f32.vlgmr.msra.gmra.mxu1 %vm1221_vm7, %v3722_v22 }
  0xb7   :  { %3234 = vmatmul.msk.f32.vlgmr.msrb.gmra.mxu2 %vm1221_vm7, %v3722_v22  ;;  %v598_v50 = vpop.f32.mrf.mxu2 }
  0xb8   :  { %v621_v51 = vpop.f32.mrf.mxu3  ;;  %v555_v53 = vpop.f32.mrf.mxu0  ;;  %v1111_v61 = vmul.f32 0.1, %v598_v50  ;;  %vm1051_vm9 = vcmp.gt.f32.partialorder %v598_v50, 0.0 }
  0xb9   :  { %v578_v54 = vpop.f32.mrf.mxu1  ;;  %v1139_v55 = vmul.f32 0.1, %v555_v53  ;;  %vm1079_vm5 = vcmp.gt.f32.partialorder %v555_v53, 0.0  ;;  %v1112_v62 = vmul.f32 0.1, %v621_v51  ;;  %vm1052_vm12 = vcmp.gt.f32.partialorder %v621_v51, 0.0 }
  0xba   :  { %v1140_v56 = vmul.f32 0.1, %v578_v54  ;;  %vm1080_vm6 = vcmp.gt.f32.partialorder %v578_v54, 0.0  ;;  %v3795_v9 = vsel %vm1051_vm9, %v598_v50, %v1111_v61 }
  0xbb   :  { %v3775_v57 = vsel %vm1079_vm5, %v555_v53, %v1139_v55  ;;  %v3799_v12 = vsel %vm1052_vm12, %v621_v51, %v1112_v62 }
  0xbc   :  { %v3777_v58 = vsel %vm1080_vm6, %v578_v54, %v1140_v56  ;;  %1379 = vmatpush.msrb.mxu3 %v3775_v57 }
  0xbd   :  { %1399 = vmatpush.msrb.mxu0 %v3777_v58 }
  0xbe   :  { %1380 = vmatpush.msrb.mxu3 %v3783_v60 }
  0xbf   :  { %1400 = vmatpush.msrb.mxu0 %v3779_v59  ;;  %v601_v63 = vpop.f32.mrf.mxu2  ;;  %3235 = vmatmul.msk.f32.vlgmr.msrb.gmra.mxu3 %vm1221_vm7, %v3722_v22 }
  0xc0   :  { %v624_v1 = vpop.f32.mrf.mxu3  ;;  %3236 = vmatmul.msk.f32.vlgmr.msrb.gmra.mxu0 %vm1221_vm7, %v3722_v22  ;;  %v1141_v2 = vmul.f32 0.1, %v601_v63  ;;  %v644_v4 = vpop.f32.mrf.mxu0  ;;  %vm1081_vm10 = vcmp.gt.f32.partialorder %v601_v63, 0.0 }
  0xc1   :  { %v1142_v3 = vmul.f32 0.1, %v624_v1  ;;  %v667_v5 = vpop.f32.mrf.mxu1  ;;  %vm1082_vm11 = vcmp.gt.f32.partialorder %v624_v1, 0.0  ;;  %v1113_v16 = vmul.f32 0.1, %v644_v4  ;;  %vm1053_vm0 = vcmp.gt.f32.partialorder %v644_v4, 0.0 }
  0xc2   :  { %v3791_v6 = vsel %vm1081_vm10, %v601_v63, %v1141_v2  ;;  %v1114_v13 = vmul.f32 0.1, %v667_v5  ;;  %vm1054_vm13 = vcmp.gt.f32.partialorder %v667_v5, 0.0 }
  0xc3   :  { %v3793_v8 = vsel %vm1082_vm11, %v624_v1, %v1142_v3  ;;  %1419 = vmatpush.msrb.mxu1 %v3791_v6  ;;  %v3815_v28 = vsel %vm1053_vm0, %v644_v4, %v1113_v16 }
  0xc4   :  { %1439 = vmatpush.msra.mxu2 %v3793_v8  ;;  %v3811_v27 = vsel %vm1054_vm13, %v667_v5, %v1114_v13 }
  0xc5   :  { %1420 = vmatpush.msrb.mxu1 %v3795_v9 }
  0xc6   :  { %1440 = vmatpush.msra.mxu2 %v3799_v12  ;;  %3237 = vmatmul.msk.f32.vlgmr.msrb.gmra.mxu1 %vm1221_vm7, %v3722_v22 }
  0xc7   :  { %3238 = vmatmul.msk.f32.vlgmr.msra.gmra.mxu2 %vm1221_vm7, %v3722_v22  ;;  %v690_v14 = vpop.f32.mrf.mxu2 }
  0xc8   :  { %v713_v15 = vpop.f32.mrf.mxu3  ;;  %v647_v48 = vpop.f32.mrf.mxu0  ;;  %v1115_v29 = vmul.f32 0.1, %v690_v14  ;;  %vm1055_vm1 = vcmp.gt.f32.partialorder %v690_v14, 0.0 }
  0xc9   :  { %v670_v17 = vpop.f32.mrf.mxu1  ;;  %v1143_v18 = vmul.f32 0.1, %v647_v48  ;;  %vm1083_vm14 = vcmp.gt.f32.partialorder %v647_v48, 0.0  ;;  %v1116_v30 = vmul.f32 0.1, %v713_v15  ;;  %vm1056_vm4 = vcmp.gt.f32.partialorder %v713_v15, 0.0 }
  0xca   :  { %v1144_v24 = vmul.f32 0.1, %v670_v17  ;;  %vm1084_vm15 = vcmp.gt.f32.partialorder %v670_v17, 0.0  ;;  %v3827_v43 = vsel %vm1055_vm1, %v690_v14, %v1115_v29 }
  0xcb   :  { %v3807_v25 = vsel %vm1083_vm14, %v647_v48, %v1143_v18  ;;  %v3831_v49 = vsel %vm1056_vm4, %v713_v15, %v1116_v30 }
  0xcc   :  { %v3809_v26 = vsel %vm1084_vm15, %v670_v17, %v1144_v24  ;;  %1459 = vmatpush.msra.mxu3 %v3807_v25 }
  0xcd   :  { %1479 = vmatpush.msra.mxu0 %v3809_v26 }
  0xce   :  { %1460 = vmatpush.msra.mxu3 %v3815_v28 }
  0xcf   :  { %1480 = vmatpush.msra.mxu0 %v3811_v27  ;;  %v693_v31 = vpop.f32.mrf.mxu2  ;;  %3239 = vmatmul.msk.f32.vlgmr.msra.gmra.mxu3 %vm1221_vm7, %v3722_v22 }
  0xd0   :  { %v716_v36 = vpop.f32.mrf.mxu3  ;;  %3240 = vmatmul.msk.f32.vlgmr.msra.gmra.mxu0 %vm1221_vm7, %v3722_v22  ;;  %v1145_v37 = vmul.f32 0.1, %v693_v31  ;;  %v736_v39 = vpop.f32.mrf.mxu0  ;;  %vm1085_vm2 = vcmp.gt.f32.partialorder %v693_v31, 0.0 }
  0xd1   :  { %v1146_v38 = vmul.f32 0.1, %v716_v36  ;;  %v759_v40 = vpop.f32.mrf.mxu1  ;;  %vm1086_vm3 = vcmp.gt.f32.partialorder %v716_v36, 0.0  ;;  %v1117_v53 = vmul.f32 0.1, %v736_v39  ;;  %vm1057_vm9 = vcmp.gt.f32.partialorder %v736_v39, 0.0 }
  0xd2   :  { %v3823_v41 = vsel %vm1085_vm2, %v693_v31, %v1145_v37  ;;  %v1118_v50 = vmul.f32 0.1, %v759_v40  ;;  %vm1058_vm5 = vcmp.gt.f32.partialorder %v759_v40, 0.0 }
  0xd3   :  { %v3825_v42 = vsel %vm1086_vm3, %v716_v36, %v1146_v38  ;;  %1499 = vmatpush.msra.mxu1 %v3823_v41  ;;  %v3847_v2 = vsel %vm1057_vm9, %v736_v39, %v1117_v53 }
  0xd4   :  { %1519 = vmatpush.msrb.mxu2 %v3825_v42  ;;  %v3843_v1 = vsel %vm1058_vm5, %v759_v40, %v1118_v50 }
  0xd5   :  { %1500 = vmatpush.msra.mxu1 %v3827_v43 }
  0xd6   :  { %1520 = vmatpush.msrb.mxu2 %v3831_v49  ;;  %3241 = vmatmul.msk.f32.vlgmr.msra.gmra.mxu1 %vm1221_vm7, %v3722_v22 }
  0xd7   :  { %3242 = vmatmul.msk.f32.vlgmr.msrb.gmra.mxu2 %vm1221_vm7, %v3722_v22  ;;  %v782_v51 = vpop.f32.mrf.mxu2 }
  0xd8   :  { %v805_v52 = vpop.f32.mrf.mxu3  ;;  %v739_v54 = vpop.f32.mrf.mxu0  ;;  %v1119_v3 = vmul.f32 0.1, %v782_v51  ;;  %vm1059_vm10 = vcmp.gt.f32.partialorder %v782_v51, 0.0 }
  0xd9   :  { %v762_v55 = vpop.f32.mrf.mxu1  ;;  %v1147_v56 = vmul.f32 0.1, %v739_v54  ;;  %vm1087_vm6 = vcmp.gt.f32.partialorder %v739_v54, 0.0  ;;  %v1120_v4 = vmul.f32 0.1, %v805_v52  ;;  %vm1060_vm13 = vcmp.gt.f32.partialorder %v805_v52, 0.0 }
  0xda   :  { %v1148_v61 = vmul.f32 0.1, %v762_v55  ;;  %vm1088_vm8 = vcmp.gt.f32.partialorder %v762_v55, 0.0  ;;  %v3859_v24 = vsel %vm1059_vm10, %v782_v51, %v1119_v3 }
  0xdb   :  { %v3839_v62 = vsel %vm1087_vm6, %v739_v54, %v1147_v56  ;;  %v3863_v29 = vsel %vm1060_vm13, %v805_v52, %v1120_v4 }
  0xdc   :  { %v3841_v63 = vsel %vm1088_vm8, %v762_v55, %v1148_v61  ;;  %1539 = vmatpush.msrb.mxu3 %v3839_v62 }
  0xdd   :  { %1559 = vmatpush.msrb.mxu0 %v3841_v63 }
  0xde   :  { %1540 = vmatpush.msrb.mxu3 %v3847_v2 }
  0xdf   :  { %1560 = vmatpush.msrb.mxu0 %v3843_v1  ;;  %v785_v5 = vpop.f32.mrf.mxu2  ;;  %3243 = vmatmul.msk.f32.vlgmr.msrb.gmra.mxu3 %vm1221_vm7, %v3722_v22 }
  0xe0   :  { %v808_v13 = vpop.f32.mrf.mxu3  ;;  %3244 = vmatmul.msk.f32.vlgmr.msrb.gmra.mxu0 %vm1221_vm7, %v3722_v22  ;;  %v1149_v14 = vmul.f32 0.1, %v785_v5  ;;  %v828_v16 = vpop.f32.mrf.mxu0  ;;  %vm1089_vm11 = vcmp.gt.f32.partialorder %v785_v5, 0.0 }
  0xe1   :  { %v1150_v15 = vmul.f32 0.1, %v808_v13  ;;  %v851_v48 = vpop.f32.mrf.mxu1  ;;  %vm1090_vm12 = vcmp.gt.f32.partialorder %v808_v13, 0.0  ;;  %v1121_v37 = vmul.f32 0.1, %v828_v16  ;;  %vm1061_vm1 = vcmp.gt.f32.partialorder %v828_v16, 0.0 }
  0xe2   :  { %v3855_v17 = vsel %vm1089_vm11, %v785_v5, %v1149_v14  ;;  %v1122_v30 = vmul.f32 0.1, %v851_v48  ;;  %vm1062_vm14 = vcmp.gt.f32.partialorder %v851_v48, 0.0  ;;  %vm1071_vm11 = vcmp.gt.f32.partialorder %v3710_v7, 0.0 }
  0xe3   :  { %v3857_v18 = vsel %vm1090_vm12, %v808_v13, %v1150_v15  ;;  %1579 = vmatpush.msrb.mxu1 %v3855_v17  ;;  %v3879_v54 = vsel %vm1061_vm1, %v828_v16, %v1121_v37  ;;  %vm1041_vm12 = vcmp.gt.f32.partialorder %v3703_v0, 0.0 }
  0xe4   :  { %1599 = vmatpush.msra.mxu2 %v3857_v18  ;;  %v3875_v53 = vsel %vm1062_vm14, %v851_v48, %v1122_v30 }
  0xe5   :  { %1580 = vmatpush.msrb.mxu1 %v3859_v24 }
  0xe6   :  { %1600 = vmatpush.msra.mxu2 %v3863_v29  ;;  %3245 = vmatmul.msk.f32.vlgmr.msrb.gmra.mxu1 %vm1221_vm7, %v3722_v22 }
  0xe7   :  { %3246 = vmatmul.msk.f32.vlgmr.msra.gmra.mxu2 %vm1221_vm7, %v3722_v22  ;;  %v874_v31 = vpop.f32.mrf.mxu2 }
  0xe8   :  { %v897_v36 = vpop.f32.mrf.mxu3  ;;  %v831_v38 = vpop.f32.mrf.mxu0  ;;  %v1123_v55 = vmul.f32 0.1, %v874_v31  ;;  %vm1063_vm2 = vcmp.gt.f32.partialorder %v874_v31, 0.0 }
  0xe9   :  { %v854_v39 = vpop.f32.mrf.mxu1  ;;  %v1151_v40 = vmul.f32 0.1, %v831_v38  ;;  %vm1091_vm15 = vcmp.gt.f32.partialorder %v831_v38, 0.0  ;;  %v1124_v56 = vmul.f32 0.1, %v897_v36  ;;  %vm1064_vm5 = vcmp.gt.f32.partialorder %v897_v36, 0.0 }
  0xea   :  { %v1152_v50 = vmul.f32 0.1, %v854_v39  ;;  %vm1092_vm0 = vcmp.gt.f32.partialorder %v854_v39, 0.0  ;;  %v3891_v48 = vsel %vm1063_vm2, %v874_v31, %v1123_v55 }
  0xeb   :  { %v3871_v51 = vsel %vm1091_vm15, %v831_v38, %v1151_v40  ;;  %v3895_v30 = vsel %vm1064_vm5, %v897_v36, %v1124_v56  ;;  %v1131_v56 = vmul.f32 0.1, %v3710_v7 }
  0xec   :  { %v3873_v52 = vsel %vm1092_vm0, %v854_v39, %v1152_v50  ;;  %1619 = vmatpush.msra.mxu3 %v3871_v51  ;;  %4393 = vst [vmem:[#allocation13_spill] sm:$0xff] %v3895_v30 }
  0xed   :  { %1639 = vmatpush.msra.mxu0 %v3873_v52 }
  0xee   :  { %1620 = vmatpush.msra.mxu3 %v3879_v54 }
  0xef   :  { %1640 = vmatpush.msra.mxu0 %v3875_v53  ;;  %v877_v61 = vpop.f32.mrf.mxu2  ;;  %3247 = vmatmul.msk.f32.vlgmr.msra.gmra.mxu3 %vm1221_vm7, %v3722_v22 }
  0xf0   :  { %v900_v3 = vpop.f32.mrf.mxu3  ;;  %3248 = vmatmul.msk.f32.vlgmr.msra.gmra.mxu0 %vm1221_vm7, %v3722_v22  ;;  %v1153_v4 = vmul.f32 0.1, %v877_v61  ;;  %v920_v13 = vpop.f32.mrf.mxu0  ;;  %vm1093_vm3 = vcmp.gt.f32.partialorder %v877_v61, 0.0 }
  0xf1   :  { %v1154_v5 = vmul.f32 0.1, %v900_v3  ;;  %v943_v14 = vpop.f32.mrf.mxu1  ;;  %vm1094_vm4 = vcmp.gt.f32.partialorder %v900_v3, 0.0  ;;  %v1125_v39 = vmul.f32 0.1, %v920_v13  ;;  %vm1065_vm10 = vcmp.gt.f32.partialorder %v920_v13, 0.0 }
  0xf2   :  { %v3887_v15 = vsel %vm1093_vm3, %v877_v61, %v1153_v4  ;;  %v1126_v37 = vmul.f32 0.1, %v943_v14  ;;  %vm1066_vm6 = vcmp.gt.f32.partialorder %v943_v14, 0.0 }
  0xf3   :  { %v3889_v16 = vsel %vm1094_vm4, %v900_v3, %v1154_v5  ;;  %1659 = vmatpush.msra.mxu1 %v3887_v15  ;;  %v1101_v5 = vmul.f32 0.1, %v3703_v0 }
  0xf4   :  { %4392 = vst [vmem:[#allocation12_spill] sm:$0xff] %v3889_v16  ;;  %1679 = vmatpush.msrb.mxu2 %v3889_v16  ;;  %v3908_v4 = vsel %vm1066_vm6, %v943_v14, %v1126_v37 }
  0xf5   :  { %1660 = vmatpush.msra.mxu1 %v3891_v48  ;;  %4395 = vst [vmem:[#allocation15_spill] sm:$0xff] %v3908_v4 }
  0xf6   :  { %1680 = vmatpush.msrb.mxu2 %v3895_v30  ;;  %3249 = vmatmul.msk.f32.vlgmr.msra.gmra.mxu1 %vm1221_vm7, %v3722_v22  ;;  %v3914_v30 = vsel %vm1065_vm10, %v920_v13, %v1125_v39 }
  0xf7   :  { %3250 = vmatmul.msk.f32.vlgmr.msrb.gmra.mxu2 %vm1221_vm7, %v3722_v22  ;;  %v966_v38 = vpop.f32.mrf.mxu2  ;;  %4396 = vst [vmem:[#allocation16_spill] sm:$0xff] %v3914_v30 }
  0xf8   :  { %v989_v31 = vpop.f32.mrf.mxu3  ;;  %v923_v40 = vpop.f32.mrf.mxu0  ;;  %v1127_v16 = vmul.f32 0.1, %v966_v38  ;;  %vm1067_vm13 = vcmp.gt.f32.partialorder %v966_v38, 0.0 }
  0xf9   :  { %v946_v50 = vpop.f32.mrf.mxu1  ;;  %vm1095_vm8 = vcmp.gt.f32.partialorder %v923_v40, 0.0  ;;  %v1155_v36 = vmul.f32 0.1, %v923_v40  ;;  %v1128_v14 = vmul.f32 0.1, %v989_v31  ;;  %vm1068_vm0 = vcmp.gt.f32.partialorder %v989_v31, 0.0 }
  0xfa   :  { %vm1096_vm9 = vcmp.gt.f32.partialorder %v946_v50, 0.0  ;;  %v1156_v55 = vmul.f32 0.1, %v946_v50 }
  0xfb   :  { %v3904_v61 = vsel %vm1095_vm8, %v923_v40, %v1155_v36 }
  0xfc   :  { %v3906_v3 = vsel %vm1096_vm9, %v946_v50, %v1156_v55  ;;  %1699 = vmatpush.msrb.mxu3 %v3904_v61  ;;  %v1191_v50 = vsel %vm1071_vm11, %v3710_v7, %v1131_v56  ;;  %v1161_v55 = vsel %vm1041_vm12, %v3703_v0, %v1101_v5  ;;  %v3935_v7 = vsel %vm1068_vm0, %v989_v31, %v1128_v14  ;;  %v3942_v0 = vld [vmem:[%s4377_s2] sm:$0xff] }
  0xfd   :  { %4394 = vst [vmem:[#allocation14_spill] sm:$0xff] %v3906_v3  ;;  %1719 = vmatpush.msrb.mxu0 %v3906_v3  ;;  %v3397_v56 = vmov 0   ;;  %v4399_v14 = vld [vmem:[#allocation12_spill] sm:$0xff] }
  0xfe   :  { %1700 = vmatpush.msrb.mxu3 %v3914_v30  ;;  %v3930_v30 = vsel %vm1067_vm13, %v966_v38, %v1127_v16  ;;  %3316 = vset.pattern.permute.xlu0 %v3397_v56 }
  0xff   :  { %1720 = vmatpush.msrb.mxu0 %v3908_v4  ;;  %v969_v37 = vpop.f32.mrf.mxu2  ;;  %3251 = vmatmul.msk.f32.vlgmr.msrb.gmra.mxu3 %vm1221_vm7, %v3722_v22 }
 0x100   :  { %v992_v40 = vpop.f32.mrf.mxu3  ;;  %3252 = vmatmul.msk.f32.vlgmr.msrb.gmra.mxu0 %vm1221_vm7, %v3722_v22  ;;  %vm1097_vm14 = vcmp.gt.f32.partialorder %v969_v37, 0.0  ;;  %v1157_v13 = vmul.f32 0.1, %v969_v37  ;;  %v1012_v36 = vpop.f32.mrf.mxu0 }
 0x101   :  { %vm1098_vm15 = vcmp.gt.f32.partialorder %v992_v40, 0.0  ;;  %v1158_v39 = vmul.f32 0.1, %v992_v40  ;;  %1802 = vmatpush.msra.mxu0 %v1191_v50  ;;  %v1129_v38 = vmul.f32 0.1, %v1012_v36  ;;  %vm1069_vm2 = vcmp.gt.f32.partialorder %v1012_v36, 0.0 }
 0x102   :  { %v3925_v4 = vsel %vm1097_vm14, %v969_v37, %v1157_v13  ;;  %v62_v37 = vld [vmem:[%s4378_s3] sm:$0xff]  ;;  %v4401_v50 = vld [vmem:[#allocation13_spill] sm:$0xff] }
 0x103   :  { %1803 = vmatpush.msra.mxu0 %v1161_v55  ;;  %v3927_v3 = vsel %vm1098_vm15, %v992_v40, %v1158_v39  ;;  %1739 = vmatpush.msrb.mxu1 %v3925_v4  ;;  %v4400_v40 = vld [vmem:[#allocation15_spill] sm:$0xff] }
 0x104   :  { %1759 = vmatpush.msra.mxu2 %v3927_v3  ;;  %v4398_v5 = vld [vmem:[#allocation14_spill] sm:$0xff]  ;;  %2941 = vperm.xlu0 %3316, %v62_v37  }
 0x105   :  { %1882 = vmatpush.msrb.mxu0 %v3743_v32  ;;  %1740 = vmatpush.msrb.mxu1 %v3930_v30 }
 0x106   :  { %1760 = vmatpush.msra.mxu2 %v3935_v7  ;;  %3253 = vmatmul.msk.f32.vlgmr.msrb.gmra.mxu1 %vm1221_vm7, %v3722_v22 }
 0x107   :  { %1883 = vmatpush.msrb.mxu0 %v3751_v35  ;;  %3254 = vmatmul.msk.f32.vlgmr.msra.gmra.mxu2 %vm1221_vm7, %v3722_v22 }
 0x108   :  { %1822 = vmatpush.msra.mxu1 %v3712_v10  ;;  %1842 = vmatpush.msrb.mxu2 %v3727_v19  ;;  %v1015_v16 = vpop.f32.mrf.mxu0 }
 0x109   :  { %3256 = vmatmul.msk.f32.vlgmr.msra.gmra.mxu0 %vm1221_vm7, %v3942_v0  ;;  %vm1099_vm1 = vcmp.gt.f32.partialorder %v1015_v16, 0.0  ;;  %v1159_v31 = vmul.f32 0.1, %v1015_v16 }
 0x10a   :  { %1823 = vmatpush.msra.mxu1 %v3714_v11  ;;  %1962 = vmatpush.msra.mxu0 %v3775_v57  ;;  %v3964_v11 = vsel %vm1069_vm2, %v1012_v36, %v1129_v38 }
 0x10b   :  { %1843 = vmatpush.msrb.mxu2 %v3731_v21  ;;  %v3959_v10 = vsel %vm1099_vm1, %v1015_v16, %v1159_v31 }
 0x10c   :  { %1902 = vmatpush.msrb.mxu1 %v3745_v33  ;;  %1963 = vmatpush.msra.mxu0 %v3783_v60 }
 0x10d   :  { %1922 = vmatpush.msra.mxu2 %v3759_v44  ;;  %1779 = vmatpush.msra.mxu3 %v3959_v10 }
 0x10e   :  { %1903 = vmatpush.msrb.mxu1 %v3747_v34 }
 0x10f   :  { %1923 = vmatpush.msra.mxu2 %v3763_v46  ;;  %3257 = vmatmul.msk.f32.vlgmr.msra.gmra.mxu1 %vm1221_vm7, %v3942_v0 }
 0x110   :  { %1780 = vmatpush.msra.mxu3 %v3964_v11  ;;  %3258 = vmatmul.msk.f32.vlgmr.msrb.gmra.mxu2 %vm1221_vm7, %v3942_v0 }
 0x111   :  { %1982 = vmatpush.msra.mxu1 %v3777_v58  ;;  %2002 = vmatpush.msrb.mxu2 %v3791_v6 }
 0x112   :  { %3255 = vmatmul.msk.f32.vlgmr.msra.gmra.mxu3 %vm1221_vm7, %v3722_v22  ;;  %3260 = vmatmul.msk.f32.vlgmr.msrb.gmra.mxu0 %vm1221_vm7, %v3942_v0  ;;  %v4397_v22 = vld [vmem:[#allocation16_spill] sm:$0xff] }
 0x113   :  { %1862 = vmatpush.msrb.mxu3 %v3729_v20  ;;  %1983 = vmatpush.msra.mxu1 %v3779_v59 }
 0x114   :  { %2003 = vmatpush.msrb.mxu2 %v3795_v9  ;;  %2042 = vmatpush.msrb.mxu0 %v3807_v25 }
 0x115   :  { %1863 = vmatpush.msrb.mxu3 %v3735_v23 }
 0x116   :  { %2043 = vmatpush.msrb.mxu0 %v3815_v28 }
 0x117   :  { %1942 = vmatpush.msra.mxu3 %v3761_v45  ;;  %3261 = vmatmul.msk.f32.vlgmr.msrb.gmra.mxu1 %vm1221_vm7, %v3942_v0 }
 0x118   :  { %3262 = vmatmul.msk.f32.vlgmr.msra.gmra.mxu2 %vm1221_vm7, %v3942_v0  ;;  %2062 = vmatpush.msrb.mxu1 %v3809_v26 }
 0x119   :  { %1943 = vmatpush.msra.mxu3 %v3767_v47  ;;  %2082 = vmatpush.msra.mxu2 %v3823_v41 }
 0x11a   :  { %3259 = vmatmul.msk.f32.vlgmr.msrb.gmra.mxu3 %vm1221_vm7, %v3942_v0  ;;  %3264 = vmatmul.msk.f32.vlgmr.msra.gmra.mxu0 %vm1221_vm7, %v3942_v0 }
 0x11b   :  { %2022 = vmatpush.msrb.mxu3 %v3793_v8  ;;  %2063 = vmatpush.msrb.mxu1 %v3811_v27 }
 0x11c   :  { %2083 = vmatpush.msra.mxu2 %v3827_v43  ;;  %2122 = vmatpush.msra.mxu0 %v3839_v62 }
 0x11d   :  { %2023 = vmatpush.msrb.mxu3 %v3799_v12 }
 0x11e   :  { %2123 = vmatpush.msra.mxu0 %v3847_v2 }
 0x11f   :  { %3265 = vmatmul.msk.f32.vlgmr.msra.gmra.mxu1 %vm1221_vm7, %v3942_v0 }
 0x120   :  { %3266 = vmatmul.msk.f32.vlgmr.msrb.gmra.mxu2 %vm1221_vm7, %v3942_v0  ;;  %2142 = vmatpush.msra.mxu1 %v3841_v63 }
 0x121   :  { %2162 = vmatpush.msrb.mxu2 %v3855_v17 }
 0x122   :  { %3263 = vmatmul.msk.f32.vlgmr.msra.gmra.mxu3 %vm1221_vm7, %v3942_v0  ;;  %3268 = vmatmul.msk.f32.vlgmr.msrb.gmra.mxu0 %vm1221_vm7, %v3942_v0 }
 0x123   :  { %2102 = vmatpush.msra.mxu3 %v3825_v42  ;;  %2143 = vmatpush.msra.mxu1 %v3843_v1 }
 0x124   :  { %2163 = vmatpush.msrb.mxu2 %v3859_v24  ;;  %2202 = vmatpush.msrb.mxu0 %v3871_v51 }
 0x125   :  { %2103 = vmatpush.msra.mxu3 %v3831_v49 }
 0x126   :  { %2203 = vmatpush.msrb.mxu0 %v3879_v54 }
 0x127   :  { %3269 = vmatmul.msk.f32.vlgmr.msrb.gmra.mxu1 %vm1221_vm7, %v3942_v0 }
 0x128   :  { %3270 = vmatmul.msk.f32.vlgmr.msra.gmra.mxu2 %vm1221_vm7, %v3942_v0  ;;  %2222 = vmatpush.msrb.mxu1 %v3873_v52 }
 0x129   :  { %2242 = vmatpush.msra.mxu2 %v3887_v15 }
 0x12a   :  { %3267 = vmatmul.msk.f32.vlgmr.msrb.gmra.mxu3 %vm1221_vm7, %v3942_v0  ;;  %3272 = vmatmul.msk.f32.vlgmr.msra.gmra.mxu0 %vm1221_vm7, %v3942_v0 }
 0x12b   :  { %2182 = vmatpush.msrb.mxu3 %v3857_v18  ;;  %2223 = vmatpush.msrb.mxu1 %v3875_v53 }
 0x12c   :  { %2243 = vmatpush.msra.mxu2 %v3891_v48  ;;  %2282 = vmatpush.msra.mxu0 %v3904_v61 }
 0x12d   :  { %2183 = vmatpush.msrb.mxu3 %v3863_v29 }
 0x12e   :  { %2283 = vmatpush.msra.mxu0 %v4397_v22 }
 0x12f   :  { %3273 = vmatmul.msk.f32.vlgmr.msra.gmra.mxu1 %vm1221_vm7, %v3942_v0 }
 0x130   :  { %3274 = vmatmul.msk.f32.vlgmr.msrb.gmra.mxu2 %vm1221_vm7, %v3942_v0  ;;  %2302 = vmatpush.msra.mxu1 %v4398_v5 }
 0x131   :  { %2322 = vmatpush.msrb.mxu2 %v3925_v4 }
 0x132   :  { %3271 = vmatmul.msk.f32.vlgmr.msra.gmra.mxu3 %vm1221_vm7, %v3942_v0  ;;  %3276 = vmatmul.msk.f32.vlgmr.msrb.gmra.mxu0 %vm1221_vm7, %v3942_v0 }
 0x133   :  { %2262 = vmatpush.msra.mxu3 %v4399_v14  ;;  %2303 = vmatpush.msra.mxu1 %v4400_v40 }
 0x134   :  { %2323 = vmatpush.msrb.mxu2 %v3930_v30  ;;  %2365 = vmatpush.msrb.mxu0 %v3727_v19  ;;  %v4068_v19 = vpop.f32.mrf.mxu1 }
 0x135   :  { %2263 = vmatpush.msra.mxu3 %v4401_v50  ;;  %vm1070_vm4 = vcmp.gt.f32.partialorder %v4068_v19, 0.0 }
 0x136   :  { %2366 = vmatpush.msrb.mxu0 %v3731_v21  ;;  %v4090_v21 = vpop.f32.mrf.mxu2 }
 0x137   :  { %3277 = vmatmul.msk.f32.vlgmr.msrb.gmra.mxu1 %vm1221_vm7, %v3942_v0 }
 0x138   :  { %3278 = vmatmul.msk.f32.vlgmr.msra.gmra.mxu2 %vm1221_vm7, %v3942_v0  ;;  %2385 = vmatpush.msrb.mxu1 %v3729_v20  ;;  %v4075_v20 = vld [vmem:[%s4377_s2 + $0x10] sm:$0xff] }
 0x139   :  { %2405 = vmatpush.msra.mxu2 %v3743_v32  ;;  %v4108_v32 = vpop.f32.mrf.mxu0 }
 0x13a   :  { %3275 = vmatmul.msk.f32.vlgmr.msrb.gmra.mxu3 %vm1221_vm7, %v3942_v0  ;;  %3280 = vmatmul.msk.f32.vlgmr.msra.gmra.mxu0 %vm1221_vm7, %v3942_v0 }
 0x13b   :  { %2342 = vmatpush.msrb.mxu3 %v3927_v3  ;;  %2386 = vmatpush.msrb.mxu1 %v3735_v23 }
 0x13c   :  { %2406 = vmatpush.msra.mxu2 %v3751_v35  ;;  %2445 = vmatpush.msra.mxu0 %v3759_v44  ;;  %v4098_v23 = vpop.f32.mrf.mxu1 }
 0x13d   :  { %2343 = vmatpush.msrb.mxu3 %v3935_v7  ;;  %vm1100_vm3 = vcmp.gt.f32.partialorder %v4098_v23, 0.0 }
 0x13e   :  { %2446 = vmatpush.msra.mxu0 %v3763_v46 }
 0x13f   :  { %3281 = vmatmul.msk.f32.vlgmr.msra.gmra.mxu1 %vm1221_vm7, %v3942_v0 }
 0x140   :  { %3282 = vmatmul.msk.f32.vlgmr.msrb.gmra.mxu2 %vm1221_vm7, %v3942_v0  ;;  %2465 = vmatpush.msra.mxu1 %v3761_v45 }
 0x141   :  { %2485 = vmatpush.msrb.mxu2 %v3775_v57  ;;  %v4134_v44 = vpop.f32.mrf.mxu0 }
 0x142   :  { %3279 = vmatmul.msk.f32.vlgmr.msra.gmra.mxu3 %vm1221_vm7, %v3942_v0  ;;  %3284 = vmatmul.msk.f32.vlgmr.msrb.gmra.mxu0 %vm1221_vm7, %v4075_v20 }
 0x143   :  { %2425 = vmatpush.msra.mxu3 %v3745_v33  ;;  %2466 = vmatpush.msra.mxu1 %v3767_v47  ;;  %v4113_v33 = vpop.f32.mrf.mxu3 }
 0x144   :  { %2486 = vmatpush.msrb.mxu2 %v3783_v60  ;;  %2525 = vmatpush.msrb.mxu0 %v3791_v6  ;;  %v4128_v35 = vpop.f32.mrf.mxu1 }
 0x145   :  { %2426 = vmatpush.msra.mxu3 %v3747_v34  ;;  %v4117_v34 = vpop.f32.mrf.mxu2 }
 0x146   :  { %2526 = vmatpush.msrb.mxu0 %v3795_v9  ;;  %v1160_v9 = vmul.f32 0.1, %v4098_v23 }
 0x147   :  { %3285 = vmatmul.msk.f32.vlgmr.msrb.gmra.mxu1 %vm1221_vm7, %v4075_v20 }
 0x148   :  { %3286 = vmatmul.msk.f32.vlgmr.msra.gmra.mxu2 %vm1221_vm7, %v4075_v20  ;;  %2545 = vmatpush.msrb.mxu1 %v3793_v8 }
 0x149   :  { %2565 = vmatpush.msra.mxu2 %v3807_v25  ;;  %v1130_v25 = vmul.f32 0.1, %v4068_v19 }
 0x14a   :  { %3283 = vmatmul.msk.f32.vlgmr.msrb.gmra.mxu3 %vm1221_vm7, %v3942_v0  ;;  %3288 = vmatmul.msk.f32.vlgmr.msra.gmra.mxu0 %vm1221_vm7, %v4075_v20 }
 0x14b   :  { %2505 = vmatpush.msrb.mxu3 %v3777_v58  ;;  %2546 = vmatpush.msrb.mxu1 %v3799_v12  ;;  %v4142_v45 = vpop.f32.mrf.mxu3 }
 0x14c   :  { %2566 = vmatpush.msra.mxu2 %v3815_v28  ;;  %2605 = vmatpush.msra.mxu0 %v3823_v41  ;;  %v4156_v47 = vpop.f32.mrf.mxu1  ;;  %v1190_v28 = vsel %vm1070_vm4, %v4068_v19, %v1130_v25 }
 0x14d   :  { %2506 = vmatpush.msrb.mxu3 %v3779_v59  ;;  %v4147_v46 = vpop.f32.mrf.mxu2  ;;  %v4161_v57 = vpop.f32.mrf.mxu0 }
 0x14e   :  { %2606 = vmatpush.msra.mxu0 %v3827_v43 }
 0x14f   :  { %3289 = vmatmul.msk.f32.vlgmr.msra.gmra.mxu1 %vm1221_vm7, %v4075_v20 }
 0x150   :  { %3290 = vmatmul.msk.f32.vlgmr.msrb.gmra.mxu2 %vm1221_vm7, %v4075_v20  ;;  %2625 = vmatpush.msra.mxu1 %v3825_v42 }
 0x151   :  { %2645 = vmatpush.msrb.mxu2 %v3839_v62 }
 0x152   :  { %3287 = vmatmul.msk.f32.vlgmr.msra.gmra.mxu3 %vm1221_vm7, %v4075_v20  ;;  %3292 = vmatmul.msk.f32.vlgmr.msrb.gmra.mxu0 %vm1221_vm7, %v4075_v20 }
 0x153   :  { %2585 = vmatpush.msra.mxu3 %v3809_v26  ;;  %2626 = vmatpush.msra.mxu1 %v3831_v49  ;;  %v4172_v58 = vpop.f32.mrf.mxu3 }
 0x154   :  { %2646 = vmatpush.msrb.mxu2 %v3847_v2  ;;  %2685 = vmatpush.msrb.mxu0 %v3855_v17  ;;  %v4181_v60 = vpop.f32.mrf.mxu1 }
 0x155   :  { %2586 = vmatpush.msra.mxu3 %v3811_v27  ;;  %v4176_v59 = vpop.f32.mrf.mxu2  ;;  %v1220_v27 = vsel %vm1100_vm3, %v4098_v23, %v1160_v9 }
 0x156   :  { %2686 = vmatpush.msrb.mxu0 %v3859_v24 }
 0x157   :  { %3293 = vmatmul.msk.f32.vlgmr.msrb.gmra.mxu1 %vm1221_vm7, %v4075_v20 }
 0x158   :  { %3294 = vmatmul.msk.f32.vlgmr.msra.gmra.mxu2 %vm1221_vm7, %v4075_v20  ;;  %2705 = vmatpush.msrb.mxu1 %v3857_v18 }
 0x159   :  { %2725 = vmatpush.msra.mxu2 %v3871_v51 }
 0x15a   :  { %3291 = vmatmul.msk.f32.vlgmr.msrb.gmra.mxu3 %vm1221_vm7, %v4075_v20  ;;  %3296 = vmatmul.msk.f32.vlgmr.msra.gmra.mxu0 %vm1221_vm7, %v4075_v20 }
 0x15b   :  { %2665 = vmatpush.msrb.mxu3 %v3841_v63  ;;  %2706 = vmatpush.msrb.mxu1 %v3863_v29  ;;  %v4199_v8 = vpop.f32.mrf.mxu3 }
 0x15c   :  { %2726 = vmatpush.msra.mxu2 %v3879_v54  ;;  %2765 = vmatpush.msra.mxu0 %v3887_v15 }
 0x15d   :  { %2666 = vmatpush.msrb.mxu3 %v3843_v1  ;;  %v4191_v6 = vpop.f32.mrf.mxu0  ;;  %v4202_v12 = vpop.f32.mrf.mxu2 }
 0x15e   :  { %2766 = vmatpush.msra.mxu0 %v3891_v48 }
 0x15f   :  { %3297 = vmatmul.msk.f32.vlgmr.msra.gmra.mxu1 %vm1221_vm7, %v4075_v20 }
 0x160   :  { %3298 = vmatmul.msk.f32.vlgmr.msrb.gmra.mxu2 %vm1221_vm7, %v4075_v20  ;;  %2785 = vmatpush.msra.mxu1 %v4399_v14 }
 0x161   :  { %2805 = vmatpush.msrb.mxu2 %v3904_v61 }
 0x162   :  { %3295 = vmatmul.msk.f32.vlgmr.msra.gmra.mxu3 %vm1221_vm7, %v4075_v20  ;;  %3300 = vmatmul.msk.f32.vlgmr.msrb.gmra.mxu0 %vm1221_vm7, %v4075_v20 }
 0x163   :  { %2745 = vmatpush.msra.mxu3 %v3873_v52  ;;  %2786 = vmatpush.msra.mxu1 %v4401_v50  ;;  %v4211_v26 = vpop.f32.mrf.mxu1  ;;  %v4221_v42 = vpop.f32.mrf.mxu3 }
 0x164   :  { %2806 = vmatpush.msrb.mxu2 %v4397_v22  ;;  %2845 = vmatpush.msrb.mxu0 %v3925_v4 }
 0x165   :  { %2746 = vmatpush.msra.mxu3 %v3875_v53 }
 0x166   :  { %2846 = vmatpush.msrb.mxu0 %v3930_v30 }
 0x167   :  { %3301 = vmatmul.msk.f32.vlgmr.msrb.gmra.mxu1 %vm1221_vm7, %v4075_v20 }
 0x168   :  { %3302 = vmatmul.msk.f32.vlgmr.msra.gmra.mxu2 %vm1221_vm7, %v4075_v20  ;;  %2865 = vmatpush.msrb.mxu1 %v3927_v3 }
 0x169   :  { %2885 = vmatpush.msra.mxu2 %v3959_v10 }
 0x16a   :  { %3299 = vmatmul.msk.f32.vlgmr.msrb.gmra.mxu3 %vm1221_vm7, %v4075_v20  ;;  %3304 = vmatmul.msk.f32.vlgmr.msra.gmra.mxu0 %vm1221_vm7, %v4075_v20  ;;  %v4225_v43 = vpop.f32.mrf.mxu2 }
 0x16b   :  { %2825 = vmatpush.msrb.mxu3 %v4398_v5  ;;  %2866 = vmatpush.msrb.mxu1 %v3935_v7 }
 0x16c   :  { %2886 = vmatpush.msra.mxu2 %v3964_v11 }
 0x16d   :  { %2826 = vmatpush.msrb.mxu3 %v4400_v40  ;;  %v4219_v41 = vpop.f32.mrf.mxu0 }
 0x16f   :  { %3305 = vmatmul.msk.f32.vlgmr.msra.gmra.mxu1 %vm1221_vm7, %v4075_v20 }
 0x170   :  { %3306 = vmatmul.msk.f32.vlgmr.msrb.gmra.mxu2 %vm1221_vm7, %v4075_v20 }
 0x172   :  { %3303 = vmatmul.msk.f32.vlgmr.msra.gmra.mxu3 %vm1221_vm7, %v4075_v20  ;;  %3308 = vmatmul.msk.f32.vlgmr.msrb.gmra.mxu0 %vm1221_vm7, %v4075_v20  ;;  %v4235_v63 = vpop.f32.mrf.mxu3 }
 0x173   :  { %2905 = vmatpush.msra.mxu3 %v1220_v27  ;;  %v4231_v49 = vpop.f32.mrf.mxu1 }
 0x175   :  { %2906 = vmatpush.msra.mxu3 %v1190_v28 }
 0x176   :  { %v4288_v28 = vpop.permute.xlu0 %2941 }
 0x177   :  { %3309 = vmatmul.msk.f32.vlgmr.msrb.gmra.mxu1 %vm1221_vm7, %v4075_v20 }
 0x178   :  { %3310 = vmatmul.msk.f32.vlgmr.msra.gmra.mxu2 %vm1221_vm7, %v4075_v20 }
 0x17a   :  { %3307 = vmatmul.msk.f32.vlgmr.msrb.gmra.mxu3 %vm1221_vm7, %v4075_v20  ;;  %v4239_v1 = vpop.f32.mrf.mxu2 }
 0x17d   :  { %v4233_v62 = vpop.f32.mrf.mxu0 }
 0x182   :  { %3311 = vmatmul.msk.f32.vlgmr.msra.gmra.mxu3 %vm1221_vm7, %v4075_v20  ;;  %v4243_v18 = vpop.f32.mrf.mxu3 }
 0x183   :  { %v4241_v2 = vpop.f32.mrf.mxu1  ;;  %4402 = vst [vmem:[#allocation16_spill] sm:$0xff] %v4243_v18 }
 0x186   :  { %v1805_v17 = vpop.f32.mrf.mxu0 }
 0x187   :  { %v1806_v20 = vadd.f32 %v1805_v17, %v4090_v21 }
 0x18a   :  { %v4245_v24 = vpop.f32.mrf.mxu2 }
 0x18b   :  { %4403 = vst [vmem:[#allocation14_spill] sm:$0xff] %v4245_v24 }
 0x18c   :  { %v1825_v29 = vpop.f32.mrf.mxu1 }
 0x18d   :  { %v1826_v19 = vadd.f32 %v1825_v29, %v4113_v33 }
 0x18f   :  { %v1885_v51 = vpop.f32.mrf.mxu0 }
 0x193   :  { %v1845_v52 = vpop.f32.mrf.mxu2 }
 0x194   :  { %v1905_v54 = vpop.f32.mrf.mxu1  ;;  %v1846_v27 = vadd.f32 %v1845_v52, %v4117_v34 }
 0x195   :  { %v4247_v53 = vpop.f32.mrf.mxu3  ;;  %v1906_v17 = vadd.f32 %v1905_v54, %v4128_v35 }
 0x196   :  { %4404 = vst [vmem:[#allocation12_spill] sm:$0xff] %v4247_v53 }
 0x197   :  { %v1965_v15 = vpop.f32.mrf.mxu0 }
 0x198   :  { %v1966_v35 = vadd.f32 %v1965_v15, %v4134_v44 }
 0x19b   :  { %v1925_v48 = vpop.f32.mrf.mxu2 }
 0x19c   :  { %v1985_v61 = vpop.f32.mrf.mxu1 }
 0x19d   :  { %v1865_v30 = vpop.f32.mrf.mxu3 }
 0x19f   :  { %v4249_v3 = vpop.f32.mrf.mxu0 }
 0x1a3   :  { %v4251_v4 = vpop.f32.mrf.mxu2 }
 0x1a4   :  { %v4255_v39 = vpop.f32.mrf.mxu1 }
 0x1a5   :  { %v4253_v13 = vpop.f32.mrf.mxu3 }
 0x1a7   :  { %v4257_v36 = vpop.f32.mrf.mxu0 }
 0x1ab   :  { %v4259_v55 = vpop.f32.mrf.mxu2 }
 0x1ac   :  { %v4263_v0 = vpop.f32.mrf.mxu1 }
 0x1ad   :  { %v4261_v7 = vpop.f32.mrf.mxu3 }
 0x1af   :  { %v4265_v16 = vpop.f32.mrf.mxu0 }
 0x1b3   :  { %v4267_v38 = vpop.f32.mrf.mxu2 }
 0x1b4   :  { %v4271_v10 = vpop.f32.mrf.mxu1 }
 0x1b5   :  { %v4269_v31 = vpop.f32.mrf.mxu3 }
 0x1b7   :  { %v4273_v11 = vpop.f32.mrf.mxu0 }
 0x1bb   :  { %v4275_v22 = vpop.f32.mrf.mxu2 }
 0x1bc   :  { %v4279_v5 = vpop.f32.mrf.mxu1 }
 0x1bd   :  { %v4277_v56 = vpop.f32.mrf.mxu3  ;;  %4405 = vst [vmem:[#allocation15_spill] sm:$0xff] %v4279_v5 }
 0x1bf   :  { %v2368_v14 = vpop.f32.mrf.mxu0 }
 0x1c0   :  { %v2911_v25 = vadd.f32 %v2368_v14, %v1806_v20  ;;  %v1866_v20 = vadd.f32 %v1865_v30, %v4142_v45 }
 0x1c2   :  { %v2944_v33 = vadd.f32 %v4288_v28, %v2911_v25  ;;  %v63_v25 = vld [vmem:[#allocation6] sm:$0xff] }
 0x1c3   :  { %v4281_v37 = vpop.f32.mrf.mxu2 }
 0x1c4   :  { %4406 = vst [vmem:[#allocation13_spill] sm:$0xff] %v4281_v37  ;;  %v2388_v50 = vpop.f32.mrf.mxu1  ;;  %v3000_v52 = vmul.f32 0.1, %v2944_v33  ;;  %vm2972_vm5 = vcmp.gt.f32.partialorder %v2944_v33, 0.0 }
 0x1c5   :  { %v4283_v40 = vpop.f32.mrf.mxu3  ;;  %v2912_v23 = vadd.f32 %v2388_v50, %v1826_v19 }
 0x1c6   :  { %4407 = vst [vmem:[#allocation17_spill] sm:$0xff] %v4283_v40  ;;  %v1886_v40 = vadd.f32 %v1885_v51, %v4108_v32  ;;  %v64_v32 = vld [vmem:[#allocation6 + $0x8] sm:$0xff] }
 0x1c7   :  { %v2448_v9 = vpop.f32.mrf.mxu0  ;;  %v2945_v53 = vadd.f32 %v4288_v28, %v2912_v23 }
 0x1c8   :  { %v2915_v14 = vadd.f32 %v2448_v9, %v1886_v40 }
 0x1c9   :  { %v3001_v29 = vmul.f32 0.1, %v2945_v53  ;;  %vm2973_vm7 = vcmp.gt.f32.partialorder %v2945_v53, 0.0 }
 0x1ca   :  { %v2948_v23 = vadd.f32 %v4288_v28, %v2915_v14 }
 0x1cb   :  { %v2408_v18 = vpop.f32.mrf.mxu2  ;;  %v3029_v51 = vsel %vm2973_vm7, %v2945_v53, %v3001_v29 }
 0x1cc   :  { %v2913_v24 = vadd.f32 %v2408_v18, %v1846_v27  ;;  %v2468_v37 = vpop.f32.mrf.mxu1  ;;  %v1926_v18 = vadd.f32 %v1925_v48, %v4147_v46  ;;  %v3028_v27 = vsel %vm2972_vm5, %v2944_v33, %v3000_v52  ;;  %v3057_v45 = vmul.f32 %v3029_v51, %v64_v32  ;;  %v66_v52 = vld [vmem:[#allocation6 + $0x18] sm:$0xff] }
 0x1cd   :  { %v4291_v5 = vpop.f32.mrf.mxu3  ;;  %v2916_v19 = vadd.f32 %v2468_v37, %v1906_v17  ;;  %v1986_v17 = vadd.f32 %v1985_v61, %v4156_v47  ;;  %v3004_v53 = vmul.f32 0.1, %v2948_v23  ;;  %v3056_v15 = vmul.f32 %v3028_v27, %v63_v25 }
 0x1ce   :  { %4408 = vst [vmem:[#allocation18_spill] sm:$0xff] %v4291_v5  ;;  %v2946_v21 = vadd.f32 %v4288_v28, %v2913_v24  ;;  %v65_v5 = vld [vmem:[#allocation6 + $0x10] sm:$0xff]  ;;  %vm2976_vm8 = vcmp.gt.f32.partialorder %v2948_v23, 0.0  ;;  %v2046_v33 = vadd.f32 %v4249_v3, %v4161_v57  ;;  %v2006_v47 = vadd.f32 %v4251_v4, %v4176_v59  ;;  %v68_v4 = vld [vmem:[#allocation6 + $0x28] sm:$0xff] }
 0x1cf   :  { %v2528_v34 = vpop.f32.mrf.mxu0  ;;  %v2949_v46 = vadd.f32 %v4288_v28, %v2916_v19  ;;  %v3058_v61 = vadd.f32 %v3057_v45, %v3056_v15  ;;  %v1946_v19 = vadd.f32 %v4253_v13, %v4172_v58  ;;  %v2066_v59 = vadd.f32 %v4255_v39, %v4181_v60 }
 0x1d0   :  { %v3002_v50 = vmul.f32 0.1, %v2946_v21  ;;  %vm2974_vm6 = vcmp.gt.f32.partialorder %v2946_v21, 0.0  ;;  %v2919_v30 = vadd.f32 %v2528_v34, %v1966_v35  ;;  %v2126_v13 = vadd.f32 %v4257_v36, %v4191_v6 }
 0x1d1   :  { %vm2977_vm10 = vcmp.gt.f32.partialorder %v2949_v46, 0.0  ;;  %v2086_v36 = vadd.f32 %v4259_v55, %v4202_v12 }
 0x1d2   :  { %v3030_v37 = vsel %vm2974_vm6, %v2946_v21, %v3002_v50  ;;  %v3005_v21 = vmul.f32 0.1, %v2949_v46  ;;  %v2952_v34 = vadd.f32 %v4288_v28, %v2919_v30 }
 0x1d3   :  { %v2488_v24 = vpop.f32.mrf.mxu2 }
 0x1d4   :  { %v2917_v54 = vadd.f32 %v2488_v24, %v1926_v18  ;;  %v2548_v9 = vpop.f32.mrf.mxu1  ;;  %v3059_v18 = vmul.f32 %v3030_v37, %v65_v5  ;;  %v3032_v5 = vsel %vm2976_vm8, %v2948_v23, %v3004_v53  ;;  %v3033_v25 = vsel %vm2977_vm10, %v2949_v46, %v3005_v21  ;;  %v70_v46 = vld [vmem:[#allocation6 + $0x38] sm:$0xff]  ;;  %v71_v21 = vld [vmem:[#allocation6 + $0x40] sm:$0xff] }
 0x1d5   :  { %v2428_v40 = vpop.f32.mrf.mxu3  ;;  %v2920_v24 = vadd.f32 %v2548_v9, %v1986_v17  ;;  %v3008_v37 = vmul.f32 0.1, %v2952_v34  ;;  %v69_v17 = vld [vmem:[#allocation6 + $0x30] sm:$0xff]  ;;  %v3065_v15 = vmul.f32 %v3033_v25, %v68_v4  ;;  %vm2980_vm12 = vcmp.gt.f32.partialorder %v2952_v34, 0.0 }
 0x1d6   :  { %v2914_v48 = vadd.f32 %v2428_v40, %v1866_v20  ;;  %v2950_v29 = vadd.f32 %v4288_v28, %v2917_v54  ;;  %v67_v20 = vld [vmem:[#allocation6 + $0x20] sm:$0xff]  ;;  %v3060_v57 = vadd.f32 %v3059_v18, %v3058_v61  ;;  %v73_v4 = vld [vmem:[#allocation6 + $0x50] sm:$0xff] }
 0x1d7   :  { %v2608_v44 = vpop.f32.mrf.mxu0  ;;  %v2953_v54 = vadd.f32 %v4288_v28, %v2920_v24  ;;  %v3063_v23 = vmul.f32 %v3032_v5, %v67_v20  ;;  %v72_v20 = vld [vmem:[#allocation6 + $0x48] sm:$0xff] }
 0x1d8   :  { %v2947_v14 = vadd.f32 %v4288_v28, %v2914_v48  ;;  %v3006_v32 = vmul.f32 0.1, %v2950_v29  ;;  %vm2978_vm11 = vcmp.gt.f32.partialorder %v2950_v29, 0.0  ;;  %v2923_v30 = vadd.f32 %v2608_v44, %v2046_v33 }
 0x1d9   :  { %v3009_v39 = vmul.f32 0.1, %v2953_v54  ;;  %vm2981_vm13 = vcmp.gt.f32.partialorder %v2953_v54, 0.0 }
 0x1da   :  { %vm2975_vm9 = vcmp.gt.f32.partialorder %v2947_v14, 0.0  ;;  %v3003_v50 = vmul.f32 0.1, %v2947_v14  ;;  %v3034_v45 = vsel %vm2978_vm11, %v2950_v29, %v3006_v32  ;;  %v2026_v29 = vadd.f32 %v4261_v7, %v4199_v8 }
 0x1db   :  { %v2568_v35 = vpop.f32.mrf.mxu2  ;;  %v3067_v44 = vmul.f32 %v3034_v45, %v69_v17  ;;  %v3037_v5 = vsel %vm2981_vm13, %v2953_v54, %v3009_v39  ;;  %v2146_v8 = vadd.f32 %v4263_v0, %v4211_v26  ;;  %v2166_v26 = vadd.f32 %v4267_v38, %v4225_v43 }
 0x1dc   :  { %v3031_v51 = vsel %vm2975_vm9, %v2947_v14, %v3003_v50  ;;  %v2628_v9 = vpop.f32.mrf.mxu1  ;;  %v2921_v27 = vadd.f32 %v2568_v35, %v2006_v47  ;;  %v2956_v50 = vadd.f32 %v4288_v28, %v2923_v30  ;;  %v2106_v30 = vadd.f32 %v4269_v31, %v4221_v42 }
 0x1dd   :  { %v3061_v3 = vmul.f32 %v3031_v51, %v66_v52  ;;  %v2508_v40 = vpop.f32.mrf.mxu3  ;;  %v2924_v24 = vadd.f32 %v2628_v9, %v2066_v59  ;;  %v3036_v52 = vsel %vm2980_vm12, %v2952_v34, %v3008_v37  ;;  %v3073_v9 = vmul.f32 %v3037_v5, %v72_v20 }
 0x1de   :  { %v2918_v58 = vadd.f32 %v2508_v40, %v1946_v19  ;;  %v2954_v53 = vadd.f32 %v4288_v28, %v2921_v27  ;;  %v3012_v59 = vmul.f32 0.1, %v2956_v50  ;;  %vm2984_vm0 = vcmp.gt.f32.partialorder %v2956_v50, 0.0 }
 0x1df   :  { %v3062_v48 = vadd.f32 %v3061_v3, %v3060_v57  ;;  %v2688_v6 = vpop.f32.mrf.mxu0  ;;  %v2957_v55 = vadd.f32 %v4288_v28, %v2924_v24  ;;  %v3071_v57 = vmul.f32 %v3036_v52, %v71_v21 }
 0x1e0   :  { %v2951_v14 = vadd.f32 %v4288_v28, %v2918_v58  ;;  %v3010_v47 = vmul.f32 0.1, %v2954_v53  ;;  %vm2982_vm15 = vcmp.gt.f32.partialorder %v2954_v53, 0.0  ;;  %v2927_v7 = vadd.f32 %v2688_v6, %v2126_v13 }
 0x1e1   :  { %v3064_v60 = vadd.f32 %v3063_v23, %v3062_v48  ;;  %v3013_v0 = vmul.f32 0.1, %v2957_v55  ;;  %v74_v48 = vld [vmem:[#allocation6 + $0x58] sm:$0xff]  ;;  %vm2985_vm2 = vcmp.gt.f32.partialorder %v2957_v55, 0.0  ;;  %v2206_v6 = vadd.f32 %v4265_v16, %v4219_v41 }
 0x1e2   :  { %vm2979_vm14 = vcmp.gt.f32.partialorder %v2951_v14, 0.0  ;;  %v3007_v18 = vmul.f32 0.1, %v2951_v14  ;;  %v3038_v25 = vsel %vm2982_vm15, %v2954_v53, %v3010_v47  ;;  %v2960_v13 = vadd.f32 %v4288_v28, %v2927_v7  ;;  %v75_v53 = vld [vmem:[#allocation6 + $0x60] sm:$0xff] }
 0x1e3   :  { %v3066_v33 = vadd.f32 %v3065_v15, %v3064_v60  ;;  %v2648_v19 = vpop.f32.mrf.mxu2  ;;  %v3075_v37 = vmul.f32 %v3038_v25, %v73_v4  ;;  %v2246_v16 = vadd.f32 %v4275_v22, %v4239_v1  ;;  %v80_v4 = vld [vmem:[#allocation6 + $0x88] sm:$0xff] }
 0x1e4   :  { %v3035_v61 = vsel %vm2979_vm14, %v2951_v14, %v3007_v18  ;;  %v2708_v12 = vpop.f32.mrf.mxu1  ;;  %v2925_v34 = vadd.f32 %v2648_v19, %v2086_v36  ;;  %v3040_v14 = vsel %vm2984_vm0, %v2956_v50, %v3012_v59  ;;  %v2226_v36 = vadd.f32 %v4271_v10, %v4231_v49  ;;  %v77_v19 = vld [vmem:[#allocation6 + $0x70] sm:$0xff] }
 0x1e5   :  { %v3068_v32 = vadd.f32 %v3067_v44, %v3066_v33  ;;  %v3069_v51 = vmul.f32 %v3035_v61, %v70_v46  ;;  %v2588_v35 = vpop.f32.mrf.mxu3  ;;  %v2928_v54 = vadd.f32 %v2708_v12, %v2146_v8  ;;  %v76_v44 = vld [vmem:[#allocation6 + $0x68] sm:$0xff]  ;;  %v3041_v33 = vsel %vm2985_vm2, %v2957_v55, %v3013_v0  ;;  %v78_v12 = vld [vmem:[#allocation6 + $0x78] sm:$0xff]  ;;  %v79_v55 = vld [vmem:[#allocation6 + $0x80] sm:$0xff] }
 0x1e6   :  { %v2922_v40 = vadd.f32 %v2588_v35, %v2026_v29  ;;  %v2958_v58 = vadd.f32 %v4288_v28, %v2925_v34  ;;  %v3079_v29 = vmul.f32 %v3040_v14, %v75_v53  ;;  %v3016_v21 = vmul.f32 0.1, %v2960_v13 }
 0x1e7   :  { %v3070_v3 = vadd.f32 %v3069_v51, %v3068_v32  ;;  %v2961_v15 = vadd.f32 %v4288_v28, %v2928_v54  ;;  %v2768_v60 = vpop.f32.mrf.mxu0  ;;  %vm2988_vm4 = vcmp.gt.f32.partialorder %v2960_v13, 0.0  ;;  %v3081_v10 = vmul.f32 %v3041_v33, %v76_v44  ;;  %v83_v33 = vld [vmem:[#allocation6 + $0xa0] sm:$0xff] }
 0x1e8   :  { %v2955_v23 = vadd.f32 %v4288_v28, %v2922_v40  ;;  %v3014_v46 = vmul.f32 0.1, %v2958_v58  ;;  %vm2986_vm3 = vcmp.gt.f32.partialorder %v2958_v58, 0.0  ;;  %v2931_v61 = vadd.f32 %v2768_v60, %v2206_v6 }
 0x1e9   :  { %v3072_v27 = vadd.f32 %v3071_v57, %v3070_v3  ;;  %v3017_v47 = vmul.f32 0.1, %v2961_v15  ;;  %vm2989_vm7 = vcmp.gt.f32.partialorder %v2961_v15, 0.0  ;;  %v2186_v51 = vadd.f32 %v4277_v56, %v4235_v63 }
 0x1ea   :  { %vm2983_vm1 = vcmp.gt.f32.partialorder %v2955_v23, 0.0  ;;  %v3011_v17 = vmul.f32 0.1, %v2955_v23  ;;  %v3042_v20 = vsel %vm2986_vm3, %v2958_v58, %v3014_v46  ;;  %v3044_v35 = vsel %vm2988_vm4, %v2960_v13, %v3016_v21  ;;  %v4411_v46 = vld [vmem:[#allocation13_spill] sm:$0xff] }
 0x1eb   :  { %v3074_v45 = vadd.f32 %v3073_v9, %v3072_v27  ;;  %v2728_v39 = vpop.f32.mrf.mxu2  ;;  %v3083_v7 = vmul.f32 %v3042_v20, %v77_v19  ;;  %v3045_v34 = vsel %vm2989_vm7, %v2961_v15, %v3017_v47  ;;  %v2964_v57 = vadd.f32 %v4288_v28, %v2931_v61  ;;  %v84_v19 = vld [vmem:[#allocation6 + $0xa8] sm:$0xff] }
 0x1ec   :  { %v3039_v43 = vsel %vm2983_vm1, %v2955_v23, %v3011_v17  ;;  %v2929_v18 = vadd.f32 %v2728_v39, %v2166_v26  ;;  %v2788_v31 = vpop.f32.mrf.mxu1  ;;  %v2286_v58 = vadd.f32 %v4273_v11, %v4233_v62  ;;  %v4409_v23 = vld [vmem:[#allocation15_spill] sm:$0xff]  ;;  %v3087_v0 = vmul.f32 %v3044_v35, %v79_v55 }
 0x1ed   :  { %v3076_v38 = vadd.f32 %v3075_v37, %v3074_v45  ;;  %v2668_v24 = vpop.f32.mrf.mxu3  ;;  %v3077_v42 = vmul.f32 %v3039_v43, %v74_v48  ;;  %v2932_v32 = vadd.f32 %v2788_v31, %v2226_v36  ;;  %v2306_v26 = vadd.f32 %v4409_v23, %v4241_v2  ;;  %v82_v62 = vld [vmem:[#allocation6 + $0x98] sm:$0xff] }
 0x1ee   :  { %v2926_v52 = vadd.f32 %v2668_v24, %v2106_v30  ;;  %v2962_v41 = vadd.f32 %v4288_v28, %v2929_v18  ;;  %vm2992_vm8 = vcmp.gt.f32.partialorder %v2964_v57, 0.0  ;;  %v3020_v13 = vmul.f32 0.1, %v2964_v57  ;;  %v81_v30 = vld [vmem:[#allocation6 + $0x90] sm:$0xff] }
 0x1ef   :  { %v3078_v50 = vadd.f32 %v3077_v42, %v3076_v38  ;;  %v2965_v63 = vadd.f32 %v4288_v28, %v2932_v32  ;;  %v2848_v56 = vpop.f32.mrf.mxu0  ;;  %v3089_v45 = vmul.f32 %v3045_v34, %v80_v4  ;;  %v4410_v2 = vld [vmem:[#allocation14_spill] sm:$0xff]  ;;  %v4412_v38 = vld [vmem:[#allocation16_spill] sm:$0xff]  ;;  %v4413_v18 = vld [vmem:[#allocation17_spill] sm:$0xff] }
 0x1f0   :  { %v2959_v49 = vadd.f32 %v4288_v28, %v2926_v52  ;;  %vm2990_vm6 = vcmp.gt.f32.partialorder %v2962_v41, 0.0  ;;  %v3018_v9 = vmul.f32 0.1, %v2962_v41  ;;  %v2935_v14 = vadd.f32 %v2848_v56, %v2286_v58  ;;  %v86_v34 = vld [vmem:[#allocation6 + $0xb8] sm:$0xff] }
 0x1f1   :  { %v3080_v5 = vadd.f32 %v3079_v29, %v3078_v50  ;;  %v3021_v39 = vmul.f32 0.1, %v2965_v63  ;;  %v2326_v43 = vadd.f32 %v4411_v46, %v4410_v2  ;;  %v2266_v24 = vadd.f32 %v4413_v18, %v4412_v38 }
 0x1f2   :  { %vm2987_vm5 = vcmp.gt.f32.partialorder %v2959_v49, 0.0  ;;  %v3015_v8 = vmul.f32 0.1, %v2959_v49  ;;  %v3046_v53 = vsel %vm2990_vm6, %v2962_v41, %v3018_v9  ;;  %vm2993_vm10 = vcmp.gt.f32.partialorder %v2965_v63, 0.0 }
 0x1f3   :  { %v3082_v3 = vadd.f32 %v3081_v10, %v3080_v5  ;;  %v2808_v40 = vpop.f32.mrf.mxu2  ;;  %v3048_v36 = vsel %vm2992_vm8, %v2964_v57, %v3020_v13  ;;  %v3091_v42 = vmul.f32 %v3046_v53, %v81_v30  ;;  %v2968_v21 = vadd.f32 %v4288_v28, %v2935_v14  ;;  %v90_v14 = vld [vmem:[#allocation6 + $0xd8] sm:$0xff] }
 0x1f4   :  { %v3043_v1 = vsel %vm2987_vm5, %v2959_v49, %v3015_v8  ;;  %v2933_v22 = vadd.f32 %v2808_v40, %v2246_v16  ;;  %v2868_v17 = vpop.f32.mrf.mxu1  ;;  %v3049_v20 = vsel %vm2993_vm10, %v2965_v63, %v3021_v39  ;;  %v3095_v10 = vmul.f32 %v3048_v36, %v83_v33  ;;  %v4415_v40 = vld [vmem:[#allocation18_spill] sm:$0xff] }
 0x1f5   :  { %v2748_v59 = vpop.f32.mrf.mxu3  ;;  %v3084_v25 = vadd.f32 %v3083_v7, %v3082_v3  ;;  %v3085_v54 = vmul.f32 %v3043_v1, %v78_v12  ;;  %v2936_v6 = vadd.f32 %v2868_v17, %v2306_v26  ;;  %v3024_v35 = vmul.f32 0.1, %v2968_v21  ;;  %v85_v12 = vld [vmem:[#allocation6 + $0xb0] sm:$0xff]  ;;  %v4414_v3 = vld [vmem:[#allocation12_spill] sm:$0xff] }
 0x1f6   :  { %v2930_v27 = vadd.f32 %v2748_v59, %v2186_v51  ;;  %v2966_v15 = vadd.f32 %v4288_v28, %v2933_v22  ;;  %v3097_v51 = vmul.f32 %v3049_v20, %v84_v19  ;;  %vm2996_vm12 = vcmp.gt.f32.partialorder %v2968_v21, 0.0  ;;  %v88_v26 = vld [vmem:[#allocation6 + $0xc8] sm:$0xff]  ;;  %v89_v17 = vld [vmem:[#allocation6 + $0xd0] sm:$0xff] }
 0x1f7   :  { %v3086_v37 = vadd.f32 %v3085_v54, %v3084_v25  ;;  %v2969_v16 = vadd.f32 %v4288_v28, %v2936_v6  ;;  %v2346_v9 = vadd.f32 %v4415_v40, %v4414_v3  ;;  %v87_v25 = vld [vmem:[#allocation6 + $0xc0] sm:$0xff]  ;;  %v3052_v54 = vsel %vm2996_vm12, %v2968_v21, %v3024_v35 }
 0x1f8   :  { %v2963_v48 = vadd.f32 %v4288_v28, %v2930_v27  ;;  %v3022_v52 = vmul.f32 0.1, %v2966_v15  ;;  %vm2994_vm11 = vcmp.gt.f32.partialorder %v2966_v15, 0.0  ;;  %v3103_v13 = vmul.f32 %v3052_v54, %v87_v25 }
 0x1f9   :  { %v3088_v60 = vadd.f32 %v3087_v0, %v3086_v37  ;;  %v3025_v1 = vmul.f32 0.1, %v2969_v16  ;;  %vm2997_vm14 = vcmp.gt.f32.partialorder %v2969_v16, 0.0 }
 0x1fa   :  { %vm2991_vm9 = vcmp.gt.f32.partialorder %v2963_v48, 0.0  ;;  %v3019_v11 = vmul.f32 0.1, %v2963_v48  ;;  %v3050_v8 = vsel %vm2994_vm11, %v2966_v15, %v3022_v52 }
 0x1fb   :  { %v3090_v29 = vadd.f32 %v3089_v45, %v3088_v60  ;;  %v2888_v44 = vpop.f32.mrf.mxu2  ;;  %v3099_v22 = vmul.f32 %v3050_v8, %v85_v12  ;;  %v3053_v0 = vsel %vm2997_vm14, %v2969_v16, %v3025_v1 }
 0x1fc   :  { %v3047_v31 = vsel %vm2991_vm9, %v2963_v48, %v3019_v11  ;;  %v2937_v47 = vadd.f32 %v2888_v44, %v2326_v43  ;;  %v3105_v30 = vmul.f32 %v3053_v0, %v88_v26 }
 0x1fd   :  { %v3093_v50 = vmul.f32 %v3047_v31, %v82_v62  ;;  %v2828_v61 = vpop.f32.mrf.mxu3  ;;  %v3092_v41 = vadd.f32 %v3091_v42, %v3090_v29 }
 0x1fe   :  { %v2934_v49 = vadd.f32 %v2828_v61, %v2266_v24  ;;  %v2970_v55 = vadd.f32 %v4288_v28, %v2937_v47 }
 0x1ff   :  { %v3094_v5 = vadd.f32 %v3093_v50, %v3092_v41 }
 0x200   :  { %v2967_v32 = vadd.f32 %v4288_v28, %v2934_v49  ;;  %v3026_v63 = vmul.f32 0.1, %v2970_v55  ;;  %vm2998_vm15 = vcmp.gt.f32.partialorder %v2970_v55, 0.0 }
 0x201   :  { %v3096_v7 = vadd.f32 %v3095_v10, %v3094_v5 }
 0x202   :  { %vm2995_vm13 = vcmp.gt.f32.partialorder %v2967_v32, 0.0  ;;  %v3023_v57 = vmul.f32 0.1, %v2967_v32  ;;  %v3054_v45 = vsel %vm2998_vm15, %v2970_v55, %v3026_v63 }
 0x203   :  { %v3098_v4 = vadd.f32 %v3097_v51, %v3096_v7  ;;  %v3107_v60 = vmul.f32 %v3054_v45, %v89_v17 }
 0x204   :  { %v3051_v59 = vsel %vm2995_vm13, %v2967_v32, %v3023_v57 }
 0x205   :  { %v3101_v56 = vmul.f32 %v3051_v59, %v86_v34  ;;  %v2908_v27 = vpop.f32.mrf.mxu3  ;;  %v3100_v58 = vadd.f32 %v3099_v22, %v3098_v4 }
 0x206   :  { %v2938_v23 = vadd.f32 %v2908_v27, %v2346_v9 }
 0x207   :  { %v3102_v37 = vadd.f32 %v3101_v56, %v3100_v58 }
 0x208   :  { %v2971_v48 = vadd.f32 %v4288_v28, %v2938_v23  ;;  %v3117_v28 = vstv %s4380_s5 }
 0x209   :  { %v3104_v53 = vadd.f32 %v3103_v13, %v3102_v37 }
 0x20a   :  { %vm2999_vm0 = vcmp.gt.f32.partialorder %v2971_v48, 0.0  ;;  %v3027_v15 = vmul.f32 0.1, %v2971_v48 }
 0x20b   :  { %v3106_v62 = vadd.f32 %v3105_v30, %v3104_v53 }
 0x20c   :  { %v3055_v39 = vsel %vm2999_vm0, %v2971_v48, %v3027_v15 }
 0x20d   :  { %v3109_v11 = vmul.f32 %v3055_v39, %v90_v14  ;;  %v3108_v2 = vadd.f32 %v3107_v60, %v3106_v62 }
 0x20f   :  { %v3110_v46 = vadd.f32 %v3109_v11, %v3108_v2 }
 0x211   :  { %v3111_v43 = vrot.slane %v3110_v46, 4 }
 0x213   :  { %v3112_v38 = vadd.f32 %v3111_v43, %v3110_v46 }
 0x215   :  { %v3113_v18 = vrot.slane %v3112_v38, 2 }
 0x217   :  { %v3114_v24 = vadd.f32 %v3113_v18, %v3112_v38 }
 0x219   :  { %v3115_v6 = vrot.slane %v3114_v24, 1 }
 0x21b   :  { %v3116_v36 = vadd.f32 %v3115_v6, %v3114_v24 }
 0x21d   :  { %v3118_v42 = vadd.f32 %v3117_v28, %v3116_v36 }
 0x21f   :  { %3119 = vst [vmem:[#allocation8] sm:$0x1] %v3118_v42 }
 0x220   :  { %3130 = dma.vmem_to_hbm [thread:$0]  %s3126_s17, 16, %s3128_s20, [#allocation5]  }
 0x221   :  { %3393 = dma.done.wait [#allocation5], 16  }
 0x222   :  { %3394 = vsyncadd [#allocation5], 4294967280 }
 0x223   :  { %3135 = vsyncpa [#allocation4], 1 }
 0x224   :  { %3136 = vsyncpa [#allocation7], 1 }
 0x225   :  { %3137 = vsyncpa [#allocation5], 1 }

</bundles_post_ra>
